<compile_context>
chip_gen: v5e
topology: v5e:2x2
jax: 0.10.0
libtpu: 0.0.40
codegen_flags: <defaults>
</compile_context>

<pallas_src>
import functools

import jax
import jax.numpy as jnp
import numpy as np
from jax import lax
from jax.experimental import pallas as pl
from jax.experimental.pallas import tpu as pltpu

_SQRT10 = float(np.sqrt(10.0))


# ------------------------------------------------------------------ kernel

def _auto_attn_kernel(x_ref, xt_ref, w_ref, b_ref, mask_ref, gamma_ref,
                      out_ref, att_ref, st_ref, *, H, tq):
    """One (batch, query-row-tile) grid step.

    x_ref:    (1, C, N)   input, channel-major (conv input, value, residual)
    xt_ref:   (1, C, tq)  the tile's columns of x (residual add, avoids dynamic lane slicing)
    w_ref:    (C8p, C)    query-conv weight (zero-padded output channels)
    b_ref:    (C8p, 1)    query-conv bias   (zero-padded)
    mask_ref: (4, N)      border masks rows [h==0, h==H-1, w==0, w==W-1] (0/1 f32, lane-major)
    gamma_ref:(1,)        gamma scalar (SMEM)
    out_ref:  (1, C, tq)  gamma * (value @ attention)[:, tile] + value[:, tile]
    att_ref:  (1, tq, N)  rows [tile] of attention.permute(0,2,1), bf16
    st_ref:   (N, KC)     scratch: pixel-major 9-patch features (recomputed per tile)
    """
    N = x_ref.shape[2]
    t = pl.program_id(1)
    col0 = pl.multiple_of(t * tq, tq)

    x = x_ref[0]                                                     # (C, N) f32

    # ---- 1x1 query conv (channel-major) + per-pixel L2 normalization --------
    # softmax temperature (x10) folded in as sqrt(10): energy below is already 10*E.
    q = jnp.dot(w_ref[...], x, preferred_element_type=jnp.float32) + b_ref[...]   # (C8p, N)
    s2 = jnp.sum(q * q, axis=0, keepdims=True)                       # (1, N)
    # q / max(sqrt(s2), 1e-5) == q * rsqrt(max(s2, 1e-10))   (EUP, no VPU divide)
    qn = q * (_SQRT10 * lax.rsqrt(jnp.maximum(s2, 1e-10)))           # (C8p, N)

    m_h0 = mask_ref[0:1, :]
    m_h1 = mask_ref[1:2, :]
    m_w0 = mask_ref[2:3, :]
    m_w1 = mask_ref[3:4, :]

    def circ(a, amt):
        # circular a[:, n - amt] along the flattened pixel (lane) axis
        return pltpu.roll(a, shift=amt % N, axis=1)

    def reflect_shift(a, step, first_mask, last_mask, delta):
        # value at flattened pixel n + delta*step, reflected at the axis borders
        fwd = circ(a, -delta * step)        # a[:, n + delta*step]
        bwd = circ(a, delta * step)         # a[:, n - delta*step]  (the reflected neighbor)
        m = first_mask if delta < 0 else last_mask   # 1.0 on the border rows, else 0.0
        return m * bwd + (1.0 - m) * fwd

    # ---- 9 reflect-shifted copies, fused into one (KC, N) block -------------
    parts = []
    for di in (-1, 0, 1):
        qw = qn if di == 0 else reflect_shift(qn, H, m_w0, m_w1, di)
        for dj in (-1, 0, 1):
            parts.append(qw if dj == 0 else reflect_shift(qw, 1, m_h0, m_h1, dj))
    s_all = jnp.concatenate(parts, axis=0)                           # (KC, N)  lane-major
    s_t = jnp.transpose(s_all)                                       # (N, KC)  pixel-major
    st_ref[...] = s_t

    # ---- energy rows for this tile: ONE matmul with K = KC (f32, see header) -
    lhs = st_ref[pl.ds(col0, tq), :]                                 # (tq, KC)
    energy = lax.dot_general(lhs, s_t, (((1,), (1,)), ((), ())),
                             preferred_element_type=jnp.float32)     # (tq, N) == 10*E[tile, :]

    # ---- attention^T rows = softmax over the last (lane) axis (E symmetric) --
    energy = energy - jnp.max(energy, axis=-1, keepdims=True)
    p = jnp.exp(energy)
    att = p * pl.reciprocal(jnp.sum(p, axis=-1, keepdims=True), approx=True)
    att_ref[0] = att.astype(jnp.bfloat16)

    # ---- out[:, tile] = gamma * (value @ attention)[:, tile] + value[:, tile] -
    out = lax.dot_general(x.astype(jnp.bfloat16), att.astype(jnp.bfloat16),
                          (((1,), (1,)), ((), ())),
                          preferred_element_type=jnp.float32)        # (C, tq)
    out_ref[0] = gamma_ref[0] * out + xt_ref[0]


# ------------------------------------------------------------------ wrapper

def _vmem_limit_bytes():
    cap = 128 * 1024 * 1024
    try:
        cap = int(pltpu.get_tpu_info().vmem_capacity_bytes)
    except Exception:
        pass
    # leave headroom below the physical capacity; never request more than ~100 MiB
    return max(32 * 1024 * 1024, min(cap - 8 * 1024 * 1024, 100 * 1024 * 1024))


def _pick_tq(N):
    for cand in (256, 128, 512):
        if cand <= N and N % cand == 0:
            return cand
    return N


@functools.partial(jax.jit, static_argnames=("tq",))
def auto_attn_pallas(x, wq, bq, gamma, *, tq=None):
    """x: (B, C, W, H) f32;  wq: (C8, C) 1x1-conv weight;  bq: (C8,);  gamma: scalar."""
    B, C, W, H = x.shape
    C8 = wq.shape[0]
    N = W * H
    if tq is None:
        tq = _pick_tq(N)
    if tq > N or N % tq != 0:
        tq = N
    nt = N // tq

    C8p = max(8, -(-C8 // 8) * 8)          # zero-pad query channels to a multiple of 8
    KC = 9 * C8p

    x_cn = x.reshape(B, C, N)              # free reshape; the ONLY layout of x we feed

    w_pad = jnp.zeros((C8p, C), jnp.float32).at[:C8, :].set(wq.astype(jnp.float32))
    b_pad = jnp.zeros((C8p, 1), jnp.float32).at[:C8, 0].set(bq.astype(jnp.float32))

    idx = jnp.arange(N, dtype=jnp.int32)
    hh = idx % H
    ww = idx // H
    masks = jnp.stack([hh == 0, hh == H - 1, ww == 0, ww == W - 1],
                      axis=0).astype(jnp.float32)          # (4, N) border masks, lane-major

    gamma_arr = jnp.asarray(gamma, jnp.float32).reshape(1)

    kernel = functools.partial(_auto_attn_kernel, H=H, tq=tq)
    out_flat, att_t = pl.pallas_call(
        kernel,
        out_shape=(jax.ShapeDtypeStruct((B, C, N), jnp.float32),
                   jax.ShapeDtypeStruct((B, N, N), jnp.bfloat16)),
        grid=(B, nt),
        in_specs=[pl.BlockSpec((1, C, N), lambda b, t: (b, 0, 0)),    # full x (conv + value)
                  pl.BlockSpec((1, C, tq), lambda b, t: (b, 0, t)),   # x tile (residual add)
                  pl.BlockSpec((C8p, C), lambda b, t: (0, 0)),
                  pl.BlockSpec((C8p, 1), lambda b, t: (0, 0)),
                  pl.BlockSpec((4, N), lambda b, t: (0, 0)),
                  pl.BlockSpec(memory_space=pltpu.MemorySpace.SMEM)],
        out_specs=(pl.BlockSpec((1, C, tq), lambda b, t: (b, 0, t)),
                   pl.BlockSpec((1, tq, N), lambda b, t: (b, t, 0))),
        scratch_shapes=[pltpu.VMEM((N, KC), jnp.float32)],
        compiler_params=pltpu.CompilerParams(
            dimension_semantics=("parallel", "parallel"),
            vmem_limit_bytes=_vmem_limit_bytes()),
    )(x_cn, x_cn, w_pad, b_pad, masks, gamma_arr)

    out = out_flat.reshape(B, C, W, H)
    return out, att_t      # att_t == attention.permute(0, 2, 1)  (bfloat16)


# ------------------------------------------------------------------ pure-JAX reference

def auto_attn_ref(x, wq, bq, gamma):
    HI = lax.Precision.HIGHEST
    B, C, W, H = x.shape
    C8 = wq.shape[0]
    N = W * H
    q = jnp.einsum('dc,bchw->bdhw', wq, x, precision=HI) + bq[None, :, None, None]
    qn = jnp.sqrt(jnp.sum(q * q, axis=1, keepdims=True))
    q = q / jnp.maximum(qn, 1e-5)
    q_pad = jnp.pad(q, ((0, 0), (0, 0), (1, 1), (1, 1)), mode='reflect')
    patches = jnp.stack([q_pad[:, :, i:i + W, j:j + H]
                         for i in range(3) for j in range(3)], axis=2)       # (B, C8, 9, W, H)
    P = jnp.transpose(patches.reshape(B, C8 * 9, N), (0, 2, 1))              # (B, N, K)
    energy = jnp.einsum('bmk,bnk->bmn', P, P, precision=HI)                  # (B, N, N)
    attention = jax.nn.softmax(10.0 * energy, axis=1)
    value = x.reshape(B, C, N)
    out = jnp.einsum('bcm,bmn->bcn', value, attention, precision=HI).reshape(B, C, W, H)
    out = gamma * out + x
    return out, jnp.transpose(attention, (0, 2, 1))


# ------------------------------------------------------------------ main

if __name__ == "__main__":
    B, C, W, H = 2, 16, 16, 16         # input_nc = 16 -> query channels C8 = 2, N = 256
    C8 = C // 8

    key = jax.random.PRNGKey(0)
    kx, kw, kb = jax.random.split(key, 3)
    x = jax.random.normal(kx, (B, C, W, H), dtype=jnp.float32)
    wq = 0.2 * jax.random.normal(kw, (C8, C), dtype=jnp.float32)     # query_conv weight (1x1)
    bq = 0.1 * jax.random.normal(kb, (C8,), dtype=jnp.float32)       # query_conv bias
    gamma = jnp.float32(0.5)   # module inits gamma=0; nonzero so the attention path is exercised
    # (the module's `alpha` parameter is unused in this forward path)

    # tq=128 -> two query-row tiles per batch element (exercises the tiled grid)
    out, att_t = jax.block_until_ready(auto_attn_pallas(x, wq, bq, gamma, tq=128))
    out_ref, att_t_ref = jax.block_until_ready(auto_attn_ref(x, wq, bq, gamma))

    np.testing.assert_allclose(np.asarray(out), np.asarray(out_ref), rtol=1e-2, atol=1e-2)
    np.testing.assert_allclose(np.asarray(att_t.astype(jnp.float32)),
                               np.asarray(att_t_ref), rtol=1e-2, atol=1e-2)
    assert out.shape == (B, C, W, H) and att_t.shape == (B, W * H, W * H)

    print("KERNEL_OK")
</pallas_src>

<mosaic_0001>
module attributes {stable_mosaic.version = 11 : i64} {
  func.func @_auto_attn_kernel(%arg0: i32, %arg1: i32, %arg2: memref<1x16x256xf32, #tpu.memory_space<vmem>>, %arg3: memref<1x16x128xf32, #tpu.memory_space<vmem>>, %arg4: memref<8x16xf32, #tpu.memory_space<vmem>>, %arg5: memref<8x1xf32, #tpu.memory_space<vmem>>, %arg6: memref<4x256xf32, #tpu.memory_space<vmem>>, %arg7: memref<1xf32, #tpu.memory_space<smem>>, %arg8: memref<1x16x128xf32, #tpu.memory_space<vmem>>, %arg9: memref<1x128x256xbf16, #tpu.memory_space<vmem>>, %arg10: memref<256x72xf32, #tpu.memory_space<vmem>>) attributes {dimension_semantics = [#tpu.dimension_semantics<parallel>, #tpu.dimension_semantics<parallel>], iteration_bounds = array<i64: 2, 2>, scalar_prefetch = 0 : i64, scratch_operands = 1 : i64, tpu.core_type = #tpu.core_type<tc>, window_params = [{transform_indices = @transform_0, window_bounds = array<i64: 1, 16, 256>}, {transform_indices = @transform_1, window_bounds = array<i64: 1, 16, 128>}, {pipeline_mode = #tpu.pipeline_mode<synchronous>, transform_indices = @transform_2, window_bounds = array<i64: 8, 16>}, {pipeline_mode = #tpu.pipeline_mode<synchronous>, transform_indices = @transform_3, window_bounds = array<i64: 8, 1>}, {pipeline_mode = #tpu.pipeline_mode<synchronous>, transform_indices = @transform_4, window_bounds = array<i64: 4, 256>}, {transform_indices = @transform_5, window_bounds = array<i64: 1>}, {transform_indices = @transform_6, window_bounds = array<i64: 1, 16, 128>}, {transform_indices = @transform_7, window_bounds = array<i64: 1, 128, 256>}]} {
    %c128_i32 = arith.constant 128 : i32
    %0 = arith.muli %arg1, %c128_i32 : i32
    %1 = tpu.assume_multiple %0, 128 : i32
    %c0 = arith.constant 0 : index
    %c0_0 = arith.constant 0 : index
    %c0_1 = arith.constant 0 : index
    %2 = vector.load %arg2[%c0, %c0_0, %c0_1] : memref<1x16x256xf32, #tpu.memory_space<vmem>>, vector<1x16x256xf32>
    %3 = vector.shape_cast %2 : vector<1x16x256xf32> to vector<16x256xf32>
    %c0_2 = arith.constant 0 : index
    %c0_3 = arith.constant 0 : index
    %4 = vector.load %arg4[%c0_2, %c0_3] : memref<8x16xf32, #tpu.memory_space<vmem>>, vector<8x16xf32>
    %cst = arith.constant dense<0.000000e+00> : vector<8x256xf32>
    %5 = tpu.matmul %4, %3, %cst {dimension_numbers = #tpu.dot_dimension_numbers<[1], [0], [0], [1], [0, 0, 1, 1], [], []>} : vector<8x16xf32>, vector<16x256xf32>, vector<8x256xf32> -> vector<8x256xf32>
    %c0_4 = arith.constant 0 : index
    %c0_5 = arith.constant 0 : index
    %6 = vector.load %arg5[%c0_4, %c0_5] : memref<8x1xf32, #tpu.memory_space<vmem>>, vector<8x1xf32>
    %7 = vector.broadcast %6 : vector<8x1xf32> to vector<8x256xf32>
    %8 = arith.addf %5, %7 : vector<8x256xf32>
    %9 = arith.mulf %8, %8 : vector<8x256xf32>
    %cst_6 = arith.constant dense<0.000000e+00> : vector<256xf32>
    %10 = vector.multi_reduction <add>, %9, %cst_6 [0] : vector<8x256xf32> to vector<256xf32>
    %11 = vector.shape_cast %10 : vector<256xf32> to vector<1x256xf32>
    %cst_7 = arith.constant 1.000000e-10 : f32
    %12 = vector.broadcast %cst_7 : f32 to vector<1x256xf32>
    %13 = arith.maximumf %11, %12 : vector<1x256xf32>
    %14 = math.rsqrt %13 : vector<1x256xf32>
    %cst_8 = arith.constant 3.1622777 : f32
    %15 = vector.broadcast %cst_8 : f32 to vector<1x256xf32>
    %16 = arith.mulf %15, %14 : vector<1x256xf32>
    %17 = vector.broadcast %16 : vector<1x256xf32> to vector<8x256xf32>
    %18 = arith.mulf %8, %17 : vector<8x256xf32>
    %c0_9 = arith.constant 0 : index
    %c0_10 = arith.constant 0 : index
    %19 = vector.load %arg6[%c0_9, %c0_10] : memref<4x256xf32, #tpu.memory_space<vmem>>, vector<1x256xf32>
    %c1 = arith.constant 1 : index
    %c0_11 = arith.constant 0 : index
    %20 = vector.load %arg6[%c1, %c0_11] : memref<4x256xf32, #tpu.memory_space<vmem>>, vector<1x256xf32>
    %c2 = arith.constant 2 : index
    %c0_12 = arith.constant 0 : index
    %21 = vector.load %arg6[%c2, %c0_12] : memref<4x256xf32, #tpu.memory_space<vmem>>, vector<1x256xf32>
    %c3 = arith.constant 3 : index
    %c0_13 = arith.constant 0 : index
    %22 = vector.load %arg6[%c3, %c0_13] : memref<4x256xf32, #tpu.memory_space<vmem>>, vector<1x256xf32>
    %c16_i32 = arith.constant 16 : i32
    %23 = tpu.dynamic_rotate %18 by %c16_i32 dim 1 : vector<8x256xf32>, i32 -> vector<8x256xf32>
    %c240_i32 = arith.constant 240 : i32
    %24 = tpu.dynamic_rotate %18 by %c240_i32 dim 1 : vector<8x256xf32>, i32 -> vector<8x256xf32>
    %25 = vector.broadcast %21 : vector<1x256xf32> to vector<8x256xf32>
    %26 = arith.mulf %25, %24 : vector<8x256xf32>
    %cst_14 = arith.constant 1.000000e+00 : f32
    %27 = vector.broadcast %cst_14 : f32 to vector<1x256xf32>
    %28 = arith.subf %27, %21 : vector<1x256xf32>
    %29 = vector.broadcast %28 : vector<1x256xf32> to vector<8x256xf32>
    %30 = arith.mulf %29, %23 : vector<8x256xf32>
    %31 = arith.addf %26, %30 : vector<8x256xf32>
    %c1_i32 = arith.constant 1 : i32
    %32 = tpu.dynamic_rotate %31 by %c1_i32 dim 1 : vector<8x256xf32>, i32 -> vector<8x256xf32>
    %c255_i32 = arith.constant 255 : i32
    %33 = tpu.dynamic_rotate %31 by %c255_i32 dim 1 : vector<8x256xf32>, i32 -> vector<8x256xf32>
    %34 = vector.broadcast %19 : vector<1x256xf32> to vector<8x256xf32>
    %35 = arith.mulf %34, %33 : vector<8x256xf32>
    %cst_15 = arith.constant 1.000000e+00 : f32
    %36 = vector.broadcast %cst_15 : f32 to vector<1x256xf32>
    %37 = arith.subf %36, %19 : vector<1x256xf32>
    %38 = vector.broadcast %37 : vector<1x256xf32> to vector<8x256xf32>
    %39 = arith.mulf %38, %32 : vector<8x256xf32>
    %40 = arith.addf %35, %39 : vector<8x256xf32>
    %c255_i32_16 = arith.constant 255 : i32
    %41 = tpu.dynamic_rotate %31 by %c255_i32_16 dim 1 : vector<8x256xf32>, i32 -> vector<8x256xf32>
    %c1_i32_17 = arith.constant 1 : i32
    %42 = tpu.dynamic_rotate %31 by %c1_i32_17 dim 1 : vector<8x256xf32>, i32 -> vector<8x256xf32>
    %43 = vector.broadcast %20 : vector<1x256xf32> to vector<8x256xf32>
    %44 = arith.mulf %43, %42 : vector<8x256xf32>
    %cst_18 = arith.constant 1.000000e+00 : f32
    %45 = vector.broadcast %cst_18 : f32 to vector<1x256xf32>
    %46 = arith.subf %45, %20 : vector<1x256xf32>
    %47 = vector.broadcast %46 : vector<1x256xf32> to vector<8x256xf32>
    %48 = arith.mulf %47, %41 : vector<8x256xf32>
    %49 = arith.addf %44, %48 : vector<8x256xf32>
    %c1_i32_19 = arith.constant 1 : i32
    %50 = tpu.dynamic_rotate %18 by %c1_i32_19 dim 1 : vector<8x256xf32>, i32 -> vector<8x256xf32>
    %c255_i32_20 = arith.constant 255 : i32
    %51 = tpu.dynamic_rotate %18 by %c255_i32_20 dim 1 : vector<8x256xf32>, i32 -> vector<8x256xf32>
    %52 = vector.broadcast %19 : vector<1x256xf32> to vector<8x256xf32>
    %53 = arith.mulf %52, %51 : vector<8x256xf32>
    %cst_21 = arith.constant 1.000000e+00 : f32
    %54 = vector.broadcast %cst_21 : f32 to vector<1x256xf32>
    %55 = arith.subf %54, %19 : vector<1x256xf32>
    %56 = vector.broadcast %55 : vector<1x256xf32> to vector<8x256xf32>
    %57 = arith.mulf %56, %50 : vector<8x256xf32>
    %58 = arith.addf %53, %57 : vector<8x256xf32>
    %c255_i32_22 = arith.constant 255 : i32
    %59 = tpu.dynamic_rotate %18 by %c255_i32_22 dim 1 : vector<8x256xf32>, i32 -> vector<8x256xf32>
    %c1_i32_23 = arith.constant 1 : i32
    %60 = tpu.dynamic_rotate %18 by %c1_i32_23 dim 1 : vector<8x256xf32>, i32 -> vector<8x256xf32>
    %61 = vector.broadcast %20 : vector<1x256xf32> to vector<8x256xf32>
    %62 = arith.mulf %61, %60 : vector<8x256xf32>
    %cst_24 = arith.constant 1.000000e+00 : f32
    %63 = vector.broadcast %cst_24 : f32 to vector<1x256xf32>
    %64 = arith.subf %63, %20 : vector<1x256xf32>
    %65 = vector.broadcast %64 : vector<1x256xf32> to vector<8x256xf32>
    %66 = arith.mulf %65, %59 : vector<8x256xf32>
    %67 = arith.addf %62, %66 : vector<8x256xf32>
    %c240_i32_25 = arith.constant 240 : i32
    %68 = tpu.dynamic_rotate %18 by %c240_i32_25 dim 1 : vector<8x256xf32>, i32 -> vector<8x256xf32>
    %c16_i32_26 = arith.constant 16 : i32
    %69 = tpu.dynamic_rotate %18 by %c16_i32_26 dim 1 : vector<8x256xf32>, i32 -> vector<8x256xf32>
    %70 = vector.broadcast %22 : vector<1x256xf32> to vector<8x256xf32>
    %71 = arith.mulf %70, %69 : vector<8x256xf32>
    %cst_27 = arith.constant 1.000000e+00 : f32
    %72 = vector.broadcast %cst_27 : f32 to vector<1x256xf32>
    %73 = arith.subf %72, %22 : vector<1x256xf32>
    %74 = vector.broadcast %73 : vector<1x256xf32> to vector<8x256xf32>
    %75 = arith.mulf %74, %68 : vector<8x256xf32>
    %76 = arith.addf %71, %75 : vector<8x256xf32>
    %c1_i32_28 = arith.constant 1 : i32
    %77 = tpu.dynamic_rotate %76 by %c1_i32_28 dim 1 : vector<8x256xf32>, i32 -> vector<8x256xf32>
    %c255_i32_29 = arith.constant 255 : i32
    %78 = tpu.dynamic_rotate %76 by %c255_i32_29 dim 1 : vector<8x256xf32>, i32 -> vector<8x256xf32>
    %79 = vector.broadcast %19 : vector<1x256xf32> to vector<8x256xf32>
    %80 = arith.mulf %79, %78 : vector<8x256xf32>
    %cst_30 = arith.constant 1.000000e+00 : f32
    %81 = vector.broadcast %cst_30 : f32 to vector<1x256xf32>
    %82 = arith.subf %81, %19 : vector<1x256xf32>
    %83 = vector.broadcast %82 : vector<1x256xf32> to vector<8x256xf32>
    %84 = arith.mulf %83, %77 : vector<8x256xf32>
    %85 = arith.addf %80, %84 : vector<8x256xf32>
    %c255_i32_31 = arith.constant 255 : i32
    %86 = tpu.dynamic_rotate %76 by %c255_i32_31 dim 1 : vector<8x256xf32>, i32 -> vector<8x256xf32>
    %c1_i32_32 = arith.constant 1 : i32
    %87 = tpu.dynamic_rotate %76 by %c1_i32_32 dim 1 : vector<8x256xf32>, i32 -> vector<8x256xf32>
    %88 = vector.broadcast %20 : vector<1x256xf32> to vector<8x256xf32>
    %89 = arith.mulf %88, %87 : vector<8x256xf32>
    %cst_33 = arith.constant 1.000000e+00 : f32
    %90 = vector.broadcast %cst_33 : f32 to vector<1x256xf32>
    %91 = arith.subf %90, %20 : vector<1x256xf32>
    %92 = vector.broadcast %91 : vector<1x256xf32> to vector<8x256xf32>
    %93 = arith.mulf %92, %86 : vector<8x256xf32>
    %94 = arith.addf %89, %93 : vector<8x256xf32>
    %95 = tpu.concatenate %40, %31, %49, %58, %18, %67, %85, %76, %94 in 0 : vector<8x256xf32>, vector<8x256xf32>, vector<8x256xf32>, vector<8x256xf32>, vector<8x256xf32>, vector<8x256xf32>, vector<8x256xf32>, vector<8x256xf32>, vector<8x256xf32> -> vector<72x256xf32>
    %96 = tpu.transpose %95, [1, 0] : vector<72x256xf32> -> vector<256x72xf32>
    %c0_34 = arith.constant 0 : index
    %c0_35 = arith.constant 0 : index
    %97 = vector.load %arg10[%c0_34, %c0_35] : memref<256x72xf32, #tpu.memory_space<vmem>>, vector<256x72xf32>
    tpu.vector_store %arg10[%c0_34, %c0_35], %96 {strides = array<i32>} : memref<256x72xf32, #tpu.memory_space<vmem>>, vector<256x72xf32>,
    %98 = arith.index_cast %1 : i32 to index
    %c0_36 = arith.constant 0 : index
    %99 = vector.load %arg10[%98, %c0_36] : memref<256x72xf32, #tpu.memory_space<vmem>>, vector<128x72xf32>
    %cst_37 = arith.constant dense<0.000000e+00> : vector<128x256xf32>
    %100 = tpu.matmul %99, %96, %cst_37 {dimension_numbers = #tpu.dot_dimension_numbers<[1], [1], [0], [0], [0, 0, 1, 0], [], []>} : vector<128x72xf32>, vector<256x72xf32>, vector<128x256xf32> -> vector<128x256xf32>
    %cst_38 = arith.constant dense<0xFF800000> : vector<128xf32>
    %101 = vector.multi_reduction <maximumf>, %100, %cst_38 [1] : vector<128x256xf32> to vector<128xf32>
    %102 = vector.shape_cast %101 : vector<128xf32> to vector<128x1xf32>
    %103 = vector.broadcast %102 : vector<128x1xf32> to vector<128x256xf32>
    %104 = arith.subf %100, %103 : vector<128x256xf32>
    %105 = math.exp %104 : vector<128x256xf32>
    %cst_39 = arith.constant dense<0.000000e+00> : vector<128xf32>
    %106 = vector.multi_reduction <add>, %105, %cst_39 [1] : vector<128x256xf32> to vector<128xf32>
    %107 = vector.shape_cast %106 : vector<128xf32> to vector<128x1xf32>
    %108 = tpu.reciprocal %107 {approx = true} : vector<128x1xf32> -> vector<128x1xf32>
    %109 = vector.broadcast %108 : vector<128x1xf32> to vector<128x256xf32>
    %110 = arith.mulf %105, %109 : vector<128x256xf32>
    %111 = arith.truncf %110 : vector<128x256xf32> to vector<128x256xbf16>
    %c0_40 = arith.constant 0 : index
    %c0_41 = arith.constant 0 : index
    %c0_42 = arith.constant 0 : index
    %112 = vector.load %arg9[%c0_40, %c0_41, %c0_42] : memref<1x128x256xbf16, #tpu.memory_space<vmem>>, vector<1x128x256xbf16>
    %113 = vector.shape_cast %112 : vector<1x128x256xbf16> to vector<128x256xbf16>
    %114 = vector.shape_cast %111 : vector<128x256xbf16> to vector<1x128x256xbf16>
    tpu.vector_store %arg9[%c0_40, %c0_41, %c0_42], %114 {strides = array<i32>} : memref<1x128x256xbf16, #tpu.memory_space<vmem>>, vector<1x128x256xbf16>,
    %115 = arith.truncf %3 : vector<16x256xf32> to vector<16x256xbf16>
    %116 = arith.truncf %110 : vector<128x256xf32> to vector<128x256xbf16>
    %cst_43 = arith.constant dense<0.000000e+00> : vector<16x128xf32>
    %117 = tpu.matmul %115, %116, %cst_43 {dimension_numbers = #tpu.dot_dimension_numbers<[1], [1], [0], [0], [0, 0, 1, 0], [], []>} : vector<16x256xbf16>, vector<128x256xbf16>, vector<16x128xf32> -> vector<16x128xf32>
    %c0_44 = arith.constant 0 : index
    %118 = memref.load %arg7[%c0_44] : memref<1xf32, #tpu.memory_space<smem>>
    %119 = vector.broadcast %118 : f32 to vector<16x128xf32>
    %120 = arith.mulf %119, %117 : vector<16x128xf32>
    %c0_45 = arith.constant 0 : index
    %c0_46 = arith.constant 0 : index
    %c0_47 = arith.constant 0 : index
    %121 = vector.load %arg3[%c0_45, %c0_46, %c0_47] : memref<1x16x128xf32, #tpu.memory_space<vmem>>, vector<1x16x128xf32>
    %122 = vector.shape_cast %121 : vector<1x16x128xf32> to vector<16x128xf32>
    %123 = arith.addf %120, %122 : vector<16x128xf32>
    %c0_48 = arith.constant 0 : index
    %c0_49 = arith.constant 0 : index
    %c0_50 = arith.constant 0 : index
    %124 = vector.load %arg8[%c0_48, %c0_49, %c0_50] : memref<1x16x128xf32, #tpu.memory_space<vmem>>, vector<1x16x128xf32>
    %125 = vector.shape_cast %124 : vector<1x16x128xf32> to vector<16x128xf32>
    %126 = vector.shape_cast %123 : vector<16x128xf32> to vector<1x16x128xf32>
    tpu.vector_store %arg8[%c0_48, %c0_49, %c0_50], %126 {strides = array<i32>} : memref<1x16x128xf32, #tpu.memory_space<vmem>>, vector<1x16x128xf32>,
    return
  }
  func.func @transform_0(%arg0: i32, %arg1: i32) -> (i32, i32, i32) {
    %c0_i32 = arith.constant 0 : i32
    %c0_i32_0 = arith.constant 0 : i32
    %c0_i32_1 = arith.constant 0 : i32
    return %arg0, %c0_i32, %c0_i32_0 : i32, i32, i32
  }
  func.func @transform_1(%arg0: i32, %arg1: i32) -> (i32, i32, i32) {
    %c0_i32 = arith.constant 0 : i32
    %c0_i32_0 = arith.constant 0 : i32
    return %arg0, %c0_i32, %arg1 : i32, i32, i32
  }
  func.func @transform_2(%arg0: i32, %arg1: i32) -> (i32, i32) {
    %c0_i32 = arith.constant 0 : i32
    %c0_i32_0 = arith.constant 0 : i32
    %c0_i32_1 = arith.constant 0 : i32
    return %c0_i32, %c0_i32_0 : i32, i32
  }
  func.func @transform_3(%arg0: i32, %arg1: i32) -> (i32, i32) {
    %c0_i32 = arith.constant 0 : i32
    %c0_i32_0 = arith.constant 0 : i32
    %c0_i32_1 = arith.constant 0 : i32
    return %c0_i32, %c0_i32_0 : i32, i32
  }
  func.func @transform_4(%arg0: i32, %arg1: i32) -> (i32, i32) {
    %c0_i32 = arith.constant 0 : i32
    %c0_i32_0 = arith.constant 0 : i32
    %c0_i32_1 = arith.constant 0 : i32
    return %c0_i32, %c0_i32_0 : i32, i32
  }
  func.func @transform_5(%arg0: i32, %arg1: i32) -> i32 {
    %c0_i32 = arith.constant 0 : i32
    %c0_i32_0 = arith.constant 0 : i32
    return %c0_i32 : i32
  }
  func.func @transform_6(%arg0: i32, %arg1: i32) -> (i32, i32, i32) {
    %c0_i32 = arith.constant 0 : i32
    %c0_i32_0 = arith.constant 0 : i32
    return %arg0, %c0_i32, %arg1 : i32, i32, i32
  }
  func.func @transform_7(%arg0: i32, %arg1: i32) -> (i32, i32, i32) {
    %c0_i32 = arith.constant 0 : i32
    %c0_i32_0 = arith.constant 0 : i32
    return %arg0, %arg1, %c0_i32 : i32, i32, i32
  }
}

</mosaic_0001>

<bundles_post_ra>
// kernel: auto_attn_pallas.1
= control target key start
LH: loop header
LB: loop body
LE: loop exit
PB: predicated region body
PF: predicated region fallthrough
CT: control target
= control target key end

     0   :  { %s2741_s0 = inlined_call_operand.vmem [shape: f32[2,16,256], index: 0, kind: input, shape index: {}, may-alias: {0,1}]   ;;  %s2742_s1 = inlined_call_operand.vmem [shape: f32[2,16,256], index: 1, kind: input, shape index: {}, may-alias: {0,1}]   ;;  %s2743_s2 = inlined_call_operand.vmem [shape: f32[8,16], index: 2, kind: input, shape index: {}]   ;;  %s2744_s3 = inlined_call_operand.vmem [shape: f32[8,1], index: 3, kind: input, shape index: {}]   ;;  %s2745_s4 = inlined_call_operand.vmem [shape: f32[4,256], index: 4, kind: input, shape index: {}]   ;;  %s2746_s5 = inlined_call_operand.<no memory space> [shape: f32[1], index: 5, kind: input, shape index: {}]   ;;  %s2747_s6 = inlined_call_operand.vmem [shape: f32[2,16,256], index: 6, kind: output, shape index: {0}]   ;;  %s2748_s7 = inlined_call_operand.hbm [shape: bf16[2,256,256], index: 7, kind: output, shape index: {1}]  }
   0x1   :  { %2749 = sst [smem:[#allocation9_spill]] %s2741_s0 }
   0x2   :  { %2750 = sst [smem:[#allocation10_spill]] %s2742_s1 }
   0x3   :  { %2751 = sst [smem:[#allocation11_spill]] %s2743_s2 }
   0x4   :  { %2752 = sst [smem:[#allocation12_spill]] %s2744_s3 }
   0x5   :  { %13 = sst [smem:[#allocation3]] %s2746_s5 }
   0x6   :  { %14 = vsyncpa [#allocation7], 0 }
   0x7   :  { %16 = vsyncpa [#allocation7 + $0x1], 0  ;;  %s2010_s26 = smov 0   ;;  %s2012_s27 = smov 0  }
   0x8   :  { %s2014_s28 = smov 0   ;;  %s2016_s29 = smov 0  }
   0x9   :  { %s2018_s30 = smov 0   ;;  %s2020_s8 = smov 0  }
   0xa   :  { %s2022_s9 = smov 0   ;;  %s2024_s10 = smov 0  }
   0xb LB: > { %s1589_s5 = sadd.s32 4294967295, %s1958_s10   ;;  %s1590_s11 = sadd.s32 4294967294, %s1958_s10   ;;  %s1958_s10 = sphi %s2024_s10, %s22_s10   ;;  %s1954_s9 = sphi %s2022_s9, %s2767_s9   ;;  %s1950_s8 = sphi %s2020_s8, %s2766_s8   ;;  %s1946_s30 = sphi %s2018_s30, %s2765_s30   ;;  %s1942_s29 = sphi %s2016_s29, %s2764_s29   ;;  %s1938_s28 = sphi %s2014_s28, %s2763_s28   ;;  %s1934_s27 = sphi %s2012_s27, %s2762_s27   ;;  %s1930_s26 = sphi %s2010_s26, %s2761_s26  }
   0xc   : > { %s31_s12 = sadd.s32 1, %s1950_s8  ;;  %s34_s13 = sadd.s32 1, %s1954_s9 }
   0xd   : > { %p32_p0 = scmp.ge.s32.totalorder %s31_s12, 2  ;;  %p76_p1 = scmp.ne.s32.totalorder %s1938_s28, %s1934_s27 }
   0xe   : > { %p77_p2 = scmp.eq.s32.totalorder %s1958_s10, 0  ;;  %p192_p5 = scmp.eq.s32.totalorder %s1589_s5, 3 }
   0xf   : > { %s2769_s12 = smov (%p32_p0, %s31_s12), 0  ;;  %s2771_s13 = smov (!%p32_p0, %s34_s13), %s1954_s9 }
  0x10   : > { %s65_s14 = ssub.s32 %s1950_s8, %s2769_s12  ;;  %p2062_p3 = por %p77_p2, %p76_p1 }
  0x11   : > { %p36_p4 = scmp.ge.s32.totalorder %s2771_s13, 2  ;;  %p225_p6 = scmp.ne.s32.totalorder %s1934_s27, %s1930_s26 }
  0x12   : > { %p226_p7 = scmp.eq.s32.totalorder %s1590_s11, 3  ;;  %p2070_p8 = por %p192_p5, %p76_p1 }
  0x13   : > { %s2773_s13 = smov (%p36_p4, %s2771_s13), 0  ;;  %s69_s20 = sadd.s32 1, %s1938_s28 }
  0x14   : > { %p2074_p9 = por %p226_p7, %p225_p6  ;;  %s64_s18 = ssub.s32 %s1954_s9, %s2773_s13 }
  0x15   : > { %s66_s19 = sor.u32 %s65_s14, %s64_s18  ;;  %p1592_p11 = scmp.ge.s32.totalorder %s1958_s10, 4 }
  0x16   : > { %p67_p10 = scmp.eq.s32.totalorder %s66_s19, 0 }
  0x17   : > { %254 = sbr.rel (%p1592_p11) target bundleno = 40 (0x28), region = 32 }
  0x18   : > { %s2082_s21 = scalar_select %p67_p10, %s1938_s28, %s69_s20  }
  0x1c   : > { %265 = sbr.rel (!%p2062_p3) target bundleno = 40 (0x28), region = 40  ;;  %s267_s22 = sand.u32 (%p2062_p3), 1, %s1938_s28  }
  0x1d   : > { %s1594_s23 = sshll.u32 (%p2062_p3), %s1954_s9, 2  ;;  %s1593_s24 = sshll.u32 (%p2062_p3), %s267_s22, 4 }
  0x1e   : > { %s271_s25 = sadd.s32 (%p2062_p3), %s1950_s8, %s1594_s23  ;;  %s2756_s1 = sld [smem:[#allocation10_spill]] (%p2062_p3) }
  0x1f   : > { %s1595_s5 = sshll.u32 (%p2062_p3), %s271_s25, 3  ;;  %s269_s19 = scalar_lea.vmem (%p2062_p3), [#allocation4], %s1593_s24 }
  0x24   : > { %s273_s18 = scalar_lea.vmem %s2756_s1, %s1595_s5 }
  0x25   : > { %v304_v0 = vld [vmem:[%s273_s18] sm:$0xff]  ;;  %v306_v1 = vld [vmem:[%s273_s18 + $0x10] sm:$0xff] }
  0x26   : > { %305 = vst [vmem:[%s269_s19] sm:$0xff] %v304_v0 }
  0x27   : > { %307 = vst [vmem:[%s269_s19 + $0x8] sm:$0xff] %v306_v1 }
  0x28 PF: > { %p1596_p12 = scmp.ge.s32.totalorder %s1958_s10, 1  ;;  %p312_p13 = scmp.lt.s32.totalorder %s1958_s10, 5 }
  0x2a   : > { %p313_p0 = pnand %p1596_p12, %p312_p13 }
  0x2b   : > { %p359_p1 = scmp.lt.s32.totalorder (!%p313_p0), %s1946_s30, 1  ;;  %s2757_s3 = sld [smem:[#allocation12_spill]] (!%p313_p0) }
  0x2c   : > { %316 = sbr.rel (%p313_p0) target bundleno = 1583 (0x62f), region = 78  ;;  %s2758_s0 = sld [smem:[#allocation9_spill]] (!%p313_p0) }
  0x2d   : > { %s2759_s2 = sld [smem:[#allocation11_spill]] (!%p313_p0)  ;;  %s1961_s18 = smov (!%p313_p0), 16  }
  0x2e   : > { %s1962_s19 = smov (!%p313_p0), 112   ;;  %s1963_s15 = smov (!%p313_p0), 1  }
  0x2f   : > { %s2606_s20 = sand.u32 (!%p313_p0), 1, %s1934_s27   ;;  %s1384_s24 = sld [smem:[#allocation3]] (!%p313_p0) }
  0x30   : > { %s1597_s25 = sshll.u32 (!%p313_p0), %s2606_s20, 4 }
  0x31   : > { %v371_v2 = vld [vmem:[%s2757_s3] sm:$0xff]  ;;  %v1960_v3 = vmov 0   ;;  %s360_s22 = scalar_select %p359_p1, %s1946_s30, 1  ;;  %vm377_vm0 = vcmask 130048   ;;  %v472_v50 = vlaneseq  ;;  %vm678_vm11 = vcmask 588800  }
  0x32   : > { %1763 = vset.pattern.permute.xlu0 %v1960_v3  ;;  %v1606_v51 = vld [vmem:[%s2745_s4 + $0x2] ss:$4 sm:$0x3]  ;;  %s351_s11 = scalar_lea.vmem [#allocation5], %s1597_s25 }
  0x33   : > { %374 = vperm.xlu0 %1763, %v371_v2   ;;  %s1682_s23 = sshll.u32 %s360_s22, 5  ;;  %v370_v9 = vld [vmem:[%s2759_s2] sm:$0xff]  ;;  %v2135_v53 = vand.u32 127, %v472_v50  ;;  %v491_v54 = vsub.f32 1.0, %v1606_v51  ;;  %v485_v58 = vperm.slane %v1606_v51, 0  ;;  %v486_v59 = vperm.slane %v1606_v51, 1 }
  0x34   : > { %s363_s5 = scalar_lea.vmem %s2758_s0, %s1682_s23  ;;  %s1964_s23 = smov 127   ;;  %v1605_v50 = vld [vmem:[%s2745_s4 + $0x1] ss:$4 sm:$0x3] }
  0x35   : > { %v2103_v4 = vld [vmem:[%s363_s5 + $0x10] sm:$0xff]  ;;  %v2105_v5 = vld [vmem:[%s363_s5 + $0x18] sm:$0xff]  ;;  %v2107_v6 = vld [vmem:[%s363_s5] sm:$0xff]  ;;  %vm474_vm7 = vcmp.lt.s32.totalorder %v2135_v53, 16  ;;  %v493_v56 = vperm.slane %v491_v54, 0  ;;  %v494_v57 = vperm.slane %v491_v54, 1 }
  0x36   : > { %395 = vmatpush.msra.mxu0 %v2103_v4  ;;  %415 = vmatpush.msra.mxu1 %v2105_v5  ;;  %v1274_v7 = vpack.c.bf16 %v2103_v4, %v2107_v6  ;;  %v2113_v8 = vld [vmem:[%s363_s5 + $0x8] sm:$0xff]  ;;  %vm481_vm8 = vcmp.lt.s32.totalorder %v2135_v53, 112  ;;  %vm512_vm9 = vcmp.lt.s32.totalorder %v2135_v53, 127  ;;  %vm505_vm10 = vcmp.lt.s32.totalorder %v2135_v53, 1  ;;  %s1599_s22 = sshll.u32 %s2606_s20, 7  ;;  %s321_s5 = scalar_lea.vmem [#allocation4], %s1597_s25 }
  0x37   : > { %v1275_v10 = vpack.c.bf16 %v2105_v5, %v2113_v8  ;;  %v539_v51 = vsub.f32 1.0, %v1605_v50 }
  0x38   : > { %396 = vmatpush.msra.mxu0 %v2107_v6  ;;  %416 = vmatpush.msra.mxu1 %v2113_v8 }
  0x39   : > { %1603 = vmatmul.msk.f32.vlgmr.msra.gmra.mxu0 %vm377_vm0, %v370_v9  ;;  %1604 = vmatmul.msk.f32.vlgmr.msra.gmra.mxu1 %vm377_vm0, %v370_v9  ;;  %v542_v54 = vperm.slane %v539_v51, 1 }
  0xa5   : > { %v375_v11 = vpop.permute.xlu0 %374 }
  0xb6   : > { %v398_v12 = vpop.f32.mrf.mxu0  ;;  %v418_v13 = vpop.f32.mrf.mxu1 }
  0xb7   : > { %v399_v14 = vadd.f32 %v398_v12, %v375_v11  ;;  %v419_v15 = vadd.f32 %v418_v13, %v375_v11 }
  0xb9   : > { %v421_v16 = vmul.f32 %v399_v14, %v399_v14  ;;  %v422_v17 = vmul.f32 %v419_v15, %v419_v15 }
  0xbb   : > { %v423_v18 = vrot.slane %v421_v16, 4  ;;  %v429_v19 = vrot.slane %v422_v17, 4 }
  0xbd   : > { %v424_v20 = vadd.f32 %v423_v18, %v421_v16  ;;  %v430_v21 = vadd.f32 %v429_v19, %v422_v17 }
  0xbf   : > { %v425_v22 = vrot.slane %v424_v20, 2  ;;  %v431_v23 = vrot.slane %v430_v21, 2 }
  0xc1   : > { %v426_v24 = vadd.f32 %v425_v22, %v424_v20  ;;  %v432_v25 = vadd.f32 %v431_v23, %v430_v21 }
  0xc3   : > { %v427_v26 = vrot.slane %v426_v24, 1  ;;  %v433_v27 = vrot.slane %v432_v25, 1 }
  0xc5   : > { %v428_v28 = vadd.f32 %v427_v26, %v426_v24  ;;  %v434_v29 = vadd.f32 %v433_v27, %v432_v25 }
  0xc7   : > { %v435_v30 = vmax.f32 %v428_v28, 1e-10  ;;  %v436_v31 = vmax.f32 %v434_v29, 1e-10 }
  0xc8   : > { %v461_v29 = vld [vmem:[%s2745_s4] ss:$4 sm:$0x3] }
  0xc9   : > { %1764 = vrsqrt.f32 %v435_v30  ;;  %vm443_vm3 = vweird.f32 %v435_v30  ;;  %vm453_vm5 = vweird.f32 %v436_v31 }
  0xca   : > { %1766 = vrsqrt.f32 %v436_v31 }
  0xcf   : > { %v1765_v32 = vpop.eup %1764 }
  0xd0   : > { %v1767_v33 = vpop.eup %1766  ;;  %v438_v34 = vmul.f32 %v1765_v32, %v435_v30  ;;  %vm444_vm1 = vweird.f32 %v1765_v32  ;;  %v522_v30 = vsub.f32 1.0, %v461_v29 }
  0xd1   : > { %v448_v35 = vmul.f32 %v1767_v33, %v436_v31  ;;  %vm454_vm2 = vweird.f32 %v1767_v33  ;;  %vm445_vm4 = vmor %vm443_vm3, %vm444_vm1  ;;  %v2162_v31 = vperm.slane %v461_v29, 0 }
  0xd2   : > { %v439_v36 = vmul.f32 %v1765_v32, %v438_v34  ;;  %vm455_vm6 = vmor %vm453_vm5, %vm454_vm2 }
  0xd3   : > { %v449_v37 = vmul.f32 %v1767_v33, %v448_v35  ;;  %v2167_v35 = vperm.slane %v522_v30, 0 }
  0xd4   : > { %v440_v38 = vmul.f32 0.5, %v439_v36  ;;  %v2169_v36 = vperm.slane %v522_v30, 1 }
  0xd5   : > { %v450_v39 = vmul.f32 0.5, %v449_v37 }
  0xd6   : > { %v441_v40 = vsub.f32 1.5, %v440_v38 }
  0xd7   : > { %v451_v41 = vsub.f32 1.5, %v450_v39 }
  0xd8   : > { %v442_v42 = vmul.f32 %v1765_v32, %v441_v40 }
  0xd9   : > { %v452_v43 = vmul.f32 %v1767_v33, %v451_v41 }
  0xda   : > { %v446_v44 = vsel %vm445_vm4, %v1765_v32, %v442_v42  ;;  %v2164_v32 = vperm.slane %v461_v29, 1 }
  0xdb   : > { %v457_v45 = vmul.f32 3.1622777, %v446_v44  ;;  %v456_v46 = vsel %vm455_vm6, %v1767_v33, %v452_v43 }
  0xdc   : > { %v458_v47 = vmul.f32 3.1622777, %v456_v46 }
  0xdd   : > { %v2122_v48 = vmul.f32 %v457_v45, %v399_v14  ;;  %v1607_v14 = vld [vmem:[%s2745_s4 + $0x3] ss:$4 sm:$0x3] }
  0xde   : > { %v2124_v49 = vmul.f32 %v458_v47, %v419_v15  ;;  %v580_v15 = vsub.f32 1.0, %v1607_v14  ;;  %v574_v17 = vperm.slane %v1607_v14, 0  ;;  %v575_v22 = vperm.slane %v1607_v14, 1 }
  0xdf   : > { %468 = vrot.lane.b32.xlu0 %v2122_v48, %s1961_s18 }
  0xe0   : > { %479 = vrot.lane.b32.xlu2 %v2124_v49, %s1962_s19  ;;  %470 = vrot.lane.b32.xlu1 %v2124_v49, %s1961_s18  ;;  %v582_v16 = vperm.slane %v580_v15, 0  ;;  %v583_v20 = vperm.slane %v580_v15, 1  ;;  %s1674_s18 = sshll.u32 (%p2070_p8), %s1946_s30, 2 }
  0xe7   : > { %549 = vrot.lane.b32.xlu0 %v2122_v48, %s1963_s15 }
  0xe8   : > { %477 = vrot.lane.b32.xlu1 %v2122_v48, %s1962_s19  ;;  %s1602_s19 = sshll.u32 %s1942_s29, 7 }
 0x13a   : > { %v480_v62 = vpop.permute.xlu2 %479 }
 0x151   : > { %v469_v55 = vpop.permute.xlu0 %468 }
 0x152   : > { %v471_v52 = vpop.permute.xlu1 %470 }
 0x153   : > { %v475_v60 = vsel %vm474_vm7, %v469_v55, %v471_v52  ;;  %v476_v61 = vsel %vm474_vm7, %v471_v52, %v469_v55  ;;  %v541_v52 = vperm.slane %v539_v51, 0  ;;  %v533_v55 = vperm.slane %v1605_v50, 0 }
 0x154   : > { %v497_v2 = vmul.f32 %v493_v56, %v476_v61  ;;  %v498_v3 = vmul.f32 %v494_v57, %v475_v60  ;;  %v578_v19 = vmul.f32 %v574_v17, %v476_v61  ;;  %v579_v24 = vmul.f32 %v575_v22, %v475_v60 }
 0x155   : > { %v534_v56 = vperm.slane %v1605_v50, 1 }
 0x159   : > { %v550_v28 = vpop.permute.xlu0 %549 }
 0x15a   : > { %v478_v63 = vpop.permute.xlu1 %477 }
 0x15b   : > { %v482_v0 = vsel %vm481_vm8, %v478_v63, %v480_v62  ;;  %v483_v1 = vsel %vm481_vm8, %v480_v62, %v478_v63 }
 0x15c   : > { %v489_v9 = vmul.f32 %v485_v58, %v482_v0  ;;  %v490_v11 = vmul.f32 %v486_v59, %v483_v1  ;;  %v586_v18 = vmul.f32 %v582_v16, %v482_v0  ;;  %v587_v23 = vmul.f32 %v583_v20, %v483_v1 }
 0x15e   : > { %v499_v12 = vadd.f32 %v497_v2, %v489_v9  ;;  %v500_v13 = vadd.f32 %v498_v3, %v490_v11  ;;  %v2148_v21 = vadd.f32 %v586_v18, %v578_v19  ;;  %v2153_v25 = vadd.f32 %v587_v23, %v579_v24 }
 0x160   : > { %508 = vrot.lane.b32.xlu1 %v499_v12, %s1964_s23  ;;  %501 = vrot.lane.b32.xlu2 %v499_v12, %s1963_s15 }
 0x161   : > { %503 = vrot.lane.b32.xlu0 %v500_v13, %s1963_s15 }
 0x168   : > { %551 = vrot.lane.b32.xlu1 %v2124_v49, %s1963_s15  ;;  %555 = vrot.lane.b32.xlu2 %v2122_v48, %s1964_s23 }
 0x169   : > { %557 = vrot.lane.b32.xlu0 %v2124_v49, %s1964_s23 }
 0x170   : > { %590 = vrot.lane.b32.xlu1 %v2148_v21, %s1963_s15  ;;  %510 = vrot.lane.b32.xlu2 %v500_v13, %s1964_s23 }
 0x171   : > { %596 = vrot.lane.b32.xlu0 %v2148_v21, %s1964_s23 }
 0x178   : > { %598 = vrot.lane.b32.xlu1 %v2153_v25, %s1964_s23  ;;  %592 = vrot.lane.b32.xlu2 %v2153_v25, %s1963_s15  ;;  %s2321_s15 = scalar_lea.vmem [#allocation2], %s1602_s19  ;;  %s2613_s23 = scalar_lea.vmem [#allocation6], %s1599_s22 }
 0x179   : > { %s1407_s19 = sadd.s32 (%p2070_p8), %s1942_s29, %s1674_s18 }
 0x1ba   : > { %v502_v26 = vpop.permute.xlu2 %501 }
 0x1c2   : > { %v556_v27 = vpop.permute.xlu2 %555 }
 0x1ca   : > { %v511_v33 = vpop.permute.xlu2 %510 }
 0x1d2   : > { %v509_v34 = vpop.permute.xlu1 %508  ;;  %v593_v30 = vpop.permute.xlu2 %592 }
 0x1d3   : > { %v513_v37 = vsel %vm512_vm9, %v509_v34, %v511_v33  ;;  %v514_v38 = vsel %vm512_vm9, %v511_v33, %v509_v34  ;;  %v504_v39 = vpop.permute.xlu0 %503 }
 0x1d4   : > { %v520_v40 = vmul.f32 %v2162_v31, %v513_v37  ;;  %v521_v41 = vmul.f32 %v2164_v32, %v514_v38  ;;  %v506_v42 = vsel %vm505_vm10, %v502_v26, %v504_v39  ;;  %v507_v43 = vsel %vm505_vm10, %v504_v39, %v502_v26 }
 0x1d5   : > { %v528_v44 = vmul.f32 %v2167_v35, %v507_v43  ;;  %v529_v45 = vmul.f32 %v2169_v36, %v506_v42  ;;  %v545_v57 = vmul.f32 %v541_v52, %v513_v37  ;;  %v546_v58 = vmul.f32 %v542_v54, %v514_v38 }
 0x1d6   : > { %v537_v59 = vmul.f32 %v533_v55, %v507_v43  ;;  %v538_v60 = vmul.f32 %v534_v56, %v506_v42 }
 0x1d7   : > { %v530_v46 = vadd.f32 %v528_v44, %v520_v40  ;;  %v531_v47 = vadd.f32 %v529_v45, %v521_v41 }
 0x1d8   : > { %v548_v63 = vadd.f32 %v546_v58, %v538_v60  ;;  %v547_v0 = vadd.f32 %v545_v57, %v537_v59 }
 0x1d9   : > { %614 = vxpose.xlu2.b32.start [1/9] (short) %v530_v46, 128  ;;  %646 = vxpose.xlu0.b32.start [1/9] (short) %v531_v47, 128 }
 0x1da   : > { %v552_v61 = vpop.permute.xlu1 %551 }
 0x1db   : > { %v558_v62 = vpop.permute.xlu0 %557  ;;  %v553_v1 = vsel %vm505_vm10, %v550_v28, %v552_v61  ;;  %v554_v2 = vsel %vm505_vm10, %v552_v61, %v550_v28 }
 0x1dc   : > { %v559_v3 = vsel %vm512_vm9, %v556_v27, %v558_v62  ;;  %v560_v9 = vsel %vm512_vm9, %v558_v62, %v556_v27  ;;  %v563_v11 = vmul.f32 %v554_v2, %v2167_v35  ;;  %v567_v18 = vmul.f32 %v554_v2, %v533_v55 }
 0x1dd   : > { %v562_v14 = vmul.f32 %v560_v9, %v2164_v32  ;;  %v568_v19 = vmul.f32 %v553_v1, %v534_v56  ;;  %v569_v20 = vmul.f32 %v559_v3, %v541_v52  ;;  %v570_v22 = vmul.f32 %v560_v9, %v542_v54 }
 0x1df   : > { %v572_v24 = vadd.f32 %v570_v22, %v568_v19  ;;  %v571_v27 = vadd.f32 %v569_v20, %v567_v18 }
 0x1e1   : > { %615 = vxpose.xlu2.b32.cont [2/9] (short) %v499_v12, 128  ;;  %647 = vxpose.xlu0.b32.cont [2/9] (short) %v500_v13, 128  ;;  %v564_v12 = vmul.f32 %v553_v1, %v2169_v36  ;;  %v561_v13 = vmul.f32 %v559_v3, %v2162_v31 }
 0x1e2   : > { %v591_v17 = vpop.permute.xlu1 %590 }
 0x1e3   : > { %v566_v15 = vadd.f32 %v564_v12, %v562_v14  ;;  %v565_v16 = vadd.f32 %v563_v11, %v561_v13  ;;  %v597_v26 = vpop.permute.xlu0 %596 }
 0x1e9   : > { %616 = vxpose.xlu2.b32.cont [3/9] (short) %v547_v0, 128  ;;  %648 = vxpose.xlu0.b32.cont [3/9] (short) %v548_v63, 128 }
 0x1ea   : > { %v599_v23 = vpop.permute.xlu1 %598 }
 0x1eb   : > { %v600_v28 = vsel %vm512_vm9, %v597_v26, %v599_v23  ;;  %v601_v29 = vsel %vm512_vm9, %v599_v23, %v597_v26 }
 0x1ec   : > { %v602_v33 = vmul.f32 %v600_v28, %v2162_v31  ;;  %v603_v34 = vmul.f32 %v601_v29, %v2164_v32  ;;  %v610_v41 = vmul.f32 %v600_v28, %v541_v52  ;;  %v611_v42 = vmul.f32 %v601_v29, %v542_v54 }
 0x1f1   : > { %649 = vxpose.xlu0.b32.cont [4/9] (short) %v566_v15, 128  ;;  %617 = vxpose.xlu2.b32.cont [4/9] (short) %v565_v16, 128 }
 0x1f9   : > { %650 = vxpose.xlu0.b32.cont [5/9] (short) %v2124_v49, 128  ;;  %618 = vxpose.xlu2.b32.cont [5/9] (short) %v2122_v48, 128  ;;  %v594_v48 = vsel %vm505_vm10, %v591_v17, %v593_v30  ;;  %v595_v49 = vsel %vm505_vm10, %v593_v30, %v591_v17 }
 0x1fa   : > { %v604_v37 = vmul.f32 %v595_v49, %v2167_v35  ;;  %v605_v38 = vmul.f32 %v594_v48, %v2169_v36  ;;  %v608_v53 = vmul.f32 %v595_v49, %v533_v55  ;;  %v609_v43 = vmul.f32 %v594_v48, %v534_v56 }
 0x1fc   : > { %v607_v39 = vadd.f32 %v605_v38, %v603_v34  ;;  %v606_v40 = vadd.f32 %v604_v37, %v602_v33  ;;  %v613_v44 = vadd.f32 %v611_v42, %v609_v43  ;;  %v612_v31 = vadd.f32 %v610_v41, %v608_v53 }
 0x201   : > { %651 = vxpose.xlu0.b32.cont [6/9] (short) %v572_v24, 128  ;;  %619 = vxpose.xlu2.b32.cont [6/9] (short) %v571_v27, 128 }
 0x209   : > { %652 = vxpose.xlu0.b32.cont [7/9] (short) %v607_v39, 128  ;;  %620 = vxpose.xlu2.b32.cont [7/9] (short) %v606_v40, 128 }
 0x211   : > { %653 = vxpose.xlu0.b32.cont [8/9] (short) %v2153_v25, 128  ;;  %621 = vxpose.xlu2.b32.cont [8/9] (short) %v2148_v21, 128 }
 0x219   : > { %654 = vxpose.xlu0.b32.end [9/9] (short) %v613_v44, 128  ;;  %622 = vxpose.xlu2.b32.end [9/9] (short) %v612_v31, 128 }
 0x272   : > { %v2214_v32 = vpop.trf.xlu2 }
 0x273   : > { %679 = vst.msk [vmem:[#allocation2] sm:$0xff] %vm678_vm11, %v2214_v32 }
 0x27a   : > { %v2218_v35 = vpop.trf.xlu2 }
 0x27b   : > { %680 = vst.msk [vmem:[#allocation2 + $0x8] sm:$0xff] %vm678_vm11, %v2218_v35 }
 0x27d   : > { %v2222_v21 = vpop.trf.xlu0 }
 0x27e   : > { %695 = vst.msk [vmem:[#allocation2 + $0x80] sm:$0xff] %vm678_vm11, %v2222_v21 }
 0x282   : > { %v2226_v25 = vpop.trf.xlu2 }
 0x283   : > { %681 = vst.msk [vmem:[#allocation2 + $0x10] sm:$0xff] %vm678_vm11, %v2226_v25 }
 0x285   : > { %v2230_v36 = vpop.trf.xlu0 }
 0x286   : > { %696 = vst.msk [vmem:[#allocation2 + $0x88] sm:$0xff] %vm678_vm11, %v2230_v36 }
 0x28a   : > { %v2234_v45 = vpop.trf.xlu2 }
 0x28b   : > { %682 = vst.msk [vmem:[#allocation2 + $0x18] sm:$0xff] %vm678_vm11, %v2234_v45 }
 0x28d   : > { %v2238_v46 = vpop.trf.xlu0 }
 0x28e   : > { %697 = vst.msk [vmem:[#allocation2 + $0x90] sm:$0xff] %vm678_vm11, %v2238_v46 }
 0x292   : > { %v2242_v47 = vpop.trf.xlu2 }
 0x293   : > { %683 = vst.msk [vmem:[#allocation2 + $0x20] sm:$0xff] %vm678_vm11, %v2242_v47 }
 0x295   : > { %v2246_v50 = vpop.trf.xlu0 }
 0x296   : > { %698 = vst.msk [vmem:[#allocation2 + $0x98] sm:$0xff] %vm678_vm11, %v2246_v50 }
 0x29a   : > { %v2250_v51 = vpop.trf.xlu2 }
 0x29b   : > { %684 = vst.msk [vmem:[#allocation2 + $0x28] sm:$0xff] %vm678_vm11, %v2250_v51 }
 0x29d   : > { %v2254_v52 = vpop.trf.xlu0 }
 0x29e   : > { %699 = vst.msk [vmem:[#allocation2 + $0xa0] sm:$0xff] %vm678_vm11, %v2254_v52 }
 0x2a2   : > { %v636_v54 = vpop.trf.xlu2 }
 0x2a3   : > { %685 = vst.msk [vmem:[#allocation2 + $0x30] sm:$0xff] %vm678_vm11, %v636_v54 }
 0x2a5   : > { %v2259_v55 = vpop.trf.xlu0 }
 0x2a6   : > { %700 = vst.msk [vmem:[#allocation2 + $0xa8] sm:$0xff] %vm678_vm11, %v2259_v55 }
 0x2aa   : > { %v637_v56 = vpop.trf.xlu2 }
 0x2ab   : > { %686 = vst.msk [vmem:[#allocation2 + $0x38] sm:$0xff] %vm678_vm11, %v637_v56 }
 0x2ad   : > { %v668_v57 = vpop.trf.xlu0 }
 0x2ae   : > { %701 = vst.msk [vmem:[#allocation2 + $0xb0] sm:$0xff] %vm678_vm11, %v668_v57 }
 0x2b2   : > { %v638_v58 = vpop.trf.xlu2 }
 0x2b3   : > { %687 = vst.msk [vmem:[#allocation2 + $0x40] sm:$0xff] %vm678_vm11, %v638_v58 }
 0x2b5   : > { %v669_v59 = vpop.trf.xlu0 }
 0x2b6   : > { %702 = vst.msk [vmem:[#allocation2 + $0xb8] sm:$0xff] %vm678_vm11, %v669_v59 }
 0x2ba   : > { %v639_v60 = vpop.trf.xlu2 }
 0x2bb   : > { %688 = vst.msk [vmem:[#allocation2 + $0x48] sm:$0xff] %vm678_vm11, %v639_v60 }
 0x2bd   : > { %v670_v61 = vpop.trf.xlu0 }
 0x2be   : > { %703 = vst.msk [vmem:[#allocation2 + $0xc0] sm:$0xff] %vm678_vm11, %v670_v61 }
 0x2c2   : > { %v640_v62 = vpop.trf.xlu2 }
 0x2c3   : > { %689 = vst.msk [vmem:[#allocation2 + $0x50] sm:$0xff] %vm678_vm11, %v640_v62 }
 0x2c5   : > { %v671_v63 = vpop.trf.xlu0 }
 0x2c6   : > { %704 = vst.msk [vmem:[#allocation2 + $0xc8] sm:$0xff] %vm678_vm11, %v671_v63 }
 0x2ca   : > { %v641_v0 = vpop.trf.xlu2 }
 0x2cb   : > { %690 = vst.msk [vmem:[#allocation2 + $0x58] sm:$0xff] %vm678_vm11, %v641_v0 }
 0x2cd   : > { %v672_v1 = vpop.trf.xlu0 }
 0x2ce   : > { %705 = vst.msk [vmem:[#allocation2 + $0xd0] sm:$0xff] %vm678_vm11, %v672_v1 }
 0x2d2   : > { %v642_v2 = vpop.trf.xlu2 }
 0x2d3   : > { %691 = vst.msk [vmem:[#allocation2 + $0x60] sm:$0xff] %vm678_vm11, %v642_v2 }
 0x2d5   : > { %v673_v3 = vpop.trf.xlu0 }
 0x2d6   : > { %706 = vst.msk [vmem:[#allocation2 + $0xd8] sm:$0xff] %vm678_vm11, %v673_v3 }
 0x2da   : > { %v643_v9 = vpop.trf.xlu2 }
 0x2db   : > { %692 = vst.msk [vmem:[#allocation2 + $0x68] sm:$0xff] %vm678_vm11, %v643_v9 }
 0x2dd   : > { %v674_v11 = vpop.trf.xlu0 }
 0x2de   : > { %707 = vst.msk [vmem:[#allocation2 + $0xe0] sm:$0xff] %vm678_vm11, %v674_v11 }
 0x2e2   : > { %v644_v12 = vpop.trf.xlu2 }
 0x2e3   : > { %693 = vst.msk [vmem:[#allocation2 + $0x70] sm:$0xff] %vm678_vm11, %v644_v12 }
 0x2e5   : > { %v675_v13 = vpop.trf.xlu0 }
 0x2e6   : > { %708 = vst.msk [vmem:[#allocation2 + $0xe8] sm:$0xff] %vm678_vm11, %v675_v13 }
 0x2ea   : > { %v645_v14 = vpop.trf.xlu2 }
 0x2eb   : > { %694 = vst.msk [vmem:[#allocation2 + $0x78] sm:$0xff] %vm678_vm11, %v645_v14  ;;  %1608 = vmatpush.xpose.msk.msra.mxu2 %vm678_vm11, %v645_v14 }
 0x2ed   : > { %v676_v15 = vpop.trf.xlu0 }
 0x2ee   : > { %709 = vst.msk [vmem:[#allocation2 + $0xf0] sm:$0xff] %vm678_vm11, %v676_v15 }
 0x2ef   : > { %1609 = vmatpush.xpose.msk.msra.mxu2 %vm678_vm11, %v644_v12 }
 0x2f3   : > { %1610 = vmatpush.xpose.msk.msra.mxu2 %vm678_vm11, %v643_v9 }
 0x2f5   : > { %v677_v16 = vpop.trf.xlu0 }
 0x2f6   : > { %710 = vst.msk [vmem:[#allocation2 + $0xf8] sm:$0xff] %vm678_vm11, %v677_v16  ;;  %1640 = vmatpush.xpose.msk.msra.mxu3 %vm678_vm11, %v677_v16 }
 0x2f7   : > { %1611 = vmatpush.xpose.msk.msra.mxu2 %vm678_vm11, %v642_v2 }
 0x2fa   : > { %1641 = vmatpush.xpose.msk.msra.mxu3 %vm678_vm11, %v676_v15 }
 0x2fb   : > { %1612 = vmatpush.xpose.msk.msra.mxu2 %vm678_vm11, %v641_v0 }
 0x2fd   : > { %v712_v17 = vld [vmem:[%s2321_s15] sm:$0xff]  ;;  %v713_v18 = vld [vmem:[%s2321_s15 + $0x8] sm:$0xff]  ;;  %v714_v19 = vld [vmem:[%s2321_s15 + $0x10] sm:$0xff] }
 0x2fe   : > { %1642 = vmatpush.xpose.msk.msra.mxu3 %vm678_vm11, %v675_v13  ;;  %v715_v20 = vld [vmem:[%s2321_s15 + $0x18] sm:$0xff]  ;;  %v716_v22 = vld [vmem:[%s2321_s15 + $0x20] sm:$0xff]  ;;  %v717_v23 = vld [vmem:[%s2321_s15 + $0x28] sm:$0xff] }
 0x2ff   : > { %1613 = vmatpush.xpose.msk.msra.mxu2 %vm678_vm11, %v640_v62  ;;  %v718_v24 = vld [vmem:[%s2321_s15 + $0x30] sm:$0xff]  ;;  %v719_v26 = vld [vmem:[%s2321_s15 + $0x38] sm:$0xff]  ;;  %v720_v27 = vld [vmem:[%s2321_s15 + $0x40] sm:$0xff] }
 0x300   : > { %v721_v28 = vld [vmem:[%s2321_s15 + $0x48] sm:$0xff]  ;;  %v722_v29 = vld [vmem:[%s2321_s15 + $0x50] sm:$0xff]  ;;  %v723_v30 = vld [vmem:[%s2321_s15 + $0x58] sm:$0xff] }
 0x301   : > { %v724_v48 = vld [vmem:[%s2321_s15 + $0x60] sm:$0xff]  ;;  %v725_v49 = vld [vmem:[%s2321_s15 + $0x68] sm:$0xff]  ;;  %v726_v33 = vld [vmem:[%s2321_s15 + $0x70] sm:$0xff] }
 0x302   : > { %1643 = vmatpush.xpose.msk.msra.mxu3 %vm678_vm11, %v674_v11  ;;  %v727_v34 = vld [vmem:[%s2321_s15 + $0x78] sm:$0xff]  ;;  %s1675_s15 = sshll.u32 (%p2070_p8), %s1407_s19, 3 }
 0x303   : > { %1614 = vmatpush.xpose.msk.msra.mxu2 %vm678_vm11, %v639_v60  ;;  %s1409_s25 = scalar_lea.vmem (%p2070_p8), %s2747_s6, %s1675_s15 }
 0x306   : > { %1644 = vmatpush.xpose.msk.msra.mxu3 %vm678_vm11, %v673_v3 }
 0x307   : > { %1615 = vmatpush.xpose.msk.msra.mxu2 %vm678_vm11, %v638_v58 }
 0x30a   : > { %1645 = vmatpush.xpose.msk.msra.mxu3 %vm678_vm11, %v672_v1 }
 0x30b   : > { %1616 = vmatpush.xpose.msk.msra.mxu2 %vm678_vm11, %v637_v56 }
 0x30e   : > { %1646 = vmatpush.xpose.msk.msra.mxu3 %vm678_vm11, %v671_v63 }
 0x30f   : > { %1617 = vmatpush.xpose.msk.msra.mxu2 %vm678_vm11, %v636_v54 }
 0x312   : > { %1647 = vmatpush.xpose.msk.msra.mxu3 %vm678_vm11, %v670_v61 }
 0x313   : > { %1618 = vmatpush.xpose.msk.msra.mxu2 %vm678_vm11, %v2250_v51 }
 0x316   : > { %1648 = vmatpush.xpose.msk.msra.mxu3 %vm678_vm11, %v669_v59 }
 0x317   : > { %1619 = vmatpush.xpose.msk.msra.mxu2 %vm678_vm11, %v2242_v47 }
 0x31a   : > { %1649 = vmatpush.xpose.msk.msra.mxu3 %vm678_vm11, %v668_v57 }
 0x31b   : > { %1620 = vmatpush.xpose.msk.msra.mxu2 %vm678_vm11, %v2234_v45 }
 0x31e   : > { %1650 = vmatpush.xpose.msk.msra.mxu3 %vm678_vm11, %v2259_v55 }
 0x31f   : > { %1621 = vmatpush.xpose.msk.msra.mxu2 %vm678_vm11, %v2226_v25 }
 0x322   : > { %1651 = vmatpush.xpose.msk.msra.mxu3 %vm678_vm11, %v2254_v52 }
 0x323   : > { %1622 = vmatpush.xpose.msk.msra.mxu2 %vm678_vm11, %v2218_v35 }
 0x326   : > { %1652 = vmatpush.xpose.msk.msra.mxu3 %vm678_vm11, %v2246_v50 }
 0x327   : > { %1623 = vmatpush.xpose.msk.msra.mxu2 %vm678_vm11, %v2214_v32 }
 0x32a   : > { %1624 = vmatmul.msk.f32.vlgmr.msra.gmra.mxu2 %vm678_vm11, %v712_v17  ;;  %1653 = vmatpush.xpose.msk.msra.mxu3 %vm678_vm11, %v2238_v46 }
 0x32e   : > { %1654 = vmatpush.xpose.msk.msra.mxu3 %vm678_vm11, %v2230_v36 }
 0x332   : > { %1625 = vmatmul.msk.f32.gmra.mxu2 %vm678_vm11, %v713_v18  ;;  %1655 = vmatpush.xpose.msk.msra.mxu3 %vm678_vm11, %v2222_v21 }
 0x335   : > { %1656 = vmatmul.msk.f32.vlgmr.msra.gmra.mxu3 %vm678_vm11, %v712_v17 }
 0x33a   : > { %1626 = vmatmul.msk.f32.gmra.mxu2 %vm678_vm11, %v714_v19 }
 0x33d   : > { %1657 = vmatmul.msk.f32.gmra.mxu3 %vm678_vm11, %v713_v18 }
 0x342   : > { %1627 = vmatmul.msk.f32.gmra.mxu2 %vm678_vm11, %v715_v20 }
 0x345   : > { %1658 = vmatmul.msk.f32.gmra.mxu3 %vm678_vm11, %v714_v19 }
 0x34a   : > { %1628 = vmatmul.msk.f32.gmra.mxu2 %vm678_vm11, %v716_v22 }
 0x34d   : > { %1659 = vmatmul.msk.f32.gmra.mxu3 %vm678_vm11, %v715_v20 }
 0x352   : > { %1629 = vmatmul.msk.f32.gmra.mxu2 %vm678_vm11, %v717_v23 }
 0x355   : > { %1660 = vmatmul.msk.f32.gmra.mxu3 %vm678_vm11, %v716_v22 }
 0x35a   : > { %1630 = vmatmul.msk.f32.gmra.mxu2 %vm678_vm11, %v718_v24 }
 0x35d   : > { %1661 = vmatmul.msk.f32.gmra.mxu3 %vm678_vm11, %v717_v23 }
 0x362   : > { %1631 = vmatmul.msk.f32.gmra.mxu2 %vm678_vm11, %v719_v26 }
 0x365   : > { %1662 = vmatmul.msk.f32.gmra.mxu3 %vm678_vm11, %v718_v24 }
 0x36a   : > { %1632 = vmatmul.msk.f32.gmra.mxu2 %vm678_vm11, %v720_v27 }
 0x36d   : > { %1663 = vmatmul.msk.f32.gmra.mxu3 %vm678_vm11, %v719_v26 }
 0x372   : > { %1633 = vmatmul.msk.f32.gmra.mxu2 %vm678_vm11, %v721_v28 }
 0x375   : > { %1664 = vmatmul.msk.f32.gmra.mxu3 %vm678_vm11, %v720_v27 }
 0x37a   : > { %1634 = vmatmul.msk.f32.gmra.mxu2 %vm678_vm11, %v722_v29 }
 0x37d   : > { %1665 = vmatmul.msk.f32.gmra.mxu3 %vm678_vm11, %v721_v28 }
 0x382   : > { %1635 = vmatmul.msk.f32.gmra.mxu2 %vm678_vm11, %v723_v30 }
 0x385   : > { %1666 = vmatmul.msk.f32.gmra.mxu3 %vm678_vm11, %v722_v29 }
 0x38a   : > { %1636 = vmatmul.msk.f32.gmra.mxu2 %vm678_vm11, %v724_v48 }
 0x38d   : > { %1667 = vmatmul.msk.f32.gmra.mxu3 %vm678_vm11, %v723_v30 }
 0x392   : > { %1637 = vmatmul.msk.f32.gmra.mxu2 %vm678_vm11, %v725_v49 }
 0x395   : > { %1668 = vmatmul.msk.f32.gmra.mxu3 %vm678_vm11, %v724_v48 }
 0x39a   : > { %1638 = vmatmul.msk.f32.gmra.mxu2 %vm678_vm11, %v726_v33 }
 0x39d   : > { %1669 = vmatmul.msk.f32.gmra.mxu3 %vm678_vm11, %v725_v49 }
 0x3a2   : > { %1639 = vmatmul.msk.f32.gmra.mxu2 %vm678_vm11, %v727_v34 }
 0x3a5   : > { %1670 = vmatmul.msk.f32.gmra.mxu3 %vm678_vm11, %v726_v33 }
 0x3ad   : > { %v2376_v37 = vpop.f32.mrf.mxu2  ;;  %1671 = vmatmul.msk.f32.gmra.mxu3 %vm678_vm11, %v727_v34 }
 0x3b5   : > { %v2379_v38 = vpop.f32.mrf.mxu2 }
 0x3b8   : > { %v2381_v39 = vpop.f32.mrf.mxu3 }
 0x3b9   : > { %v1002_v56 = vmax.f32 %v2376_v37, %v2381_v39 }
 0x3bd   : > { %v2383_v40 = vpop.f32.mrf.mxu2 }
 0x3c0   : > { %v2385_v41 = vpop.f32.mrf.mxu3 }
 0x3c1   : > { %v1005_v58 = vmax.f32 %v2379_v38, %v2385_v41 }
 0x3c5   : > { %v2387_v42 = vpop.f32.mrf.mxu2 }
 0x3c8   : > { %v2389_v53 = vpop.f32.mrf.mxu3 }
 0x3c9   : > { %v1008_v46 = vmax.f32 %v2383_v40, %v2389_v53 }
 0x3cd   : > { %v2393_v44 = vpop.f32.mrf.mxu2 }
 0x3d0   : > { %v2391_v43 = vpop.f32.mrf.mxu3 }
 0x3d1   : > { %v1011_v52 = vmax.f32 %v2387_v42, %v2391_v43 }
 0x3d5   : > { %v2399_v35 = vpop.f32.mrf.mxu2 }
 0x3d8   : > { %v2395_v31 = vpop.f32.mrf.mxu3 }
 0x3d9   : > { %v1014_v32 = vmax.f32 %v2393_v44, %v2395_v31 }
 0x3db   : > { %1015 = vmax.xlane.f32.xlu1 %v1014_v32 }
 0x3dd   : > { %v2405_v36 = vpop.f32.mrf.mxu2 }
 0x3e0   : > { %v2401_v21 = vpop.f32.mrf.mxu3 }
 0x3e1   : > { %v1017_v25 = vmax.f32 %v2399_v35, %v2401_v21 }
 0x3e3   : > { %1018 = vmax.xlane.f32.xlu1 %v1017_v25 }
 0x3e5   : > { %v2413_v50 = vpop.f32.mrf.mxu2 }
 0x3e8   : > { %v2407_v45 = vpop.f32.mrf.mxu3 }
 0x3e9   : > { %v1020_v47 = vmax.f32 %v2405_v36, %v2407_v45 }
 0x3eb   : > { %1009 = vmax.xlane.f32.xlu1 %v1008_v46  ;;  %1021 = vmax.xlane.f32.xlu2 %v1020_v47 }
 0x3ed   : > { %v913_v57 = vpop.f32.mrf.mxu2 }
 0x3f0   : > { %v2415_v51 = vpop.f32.mrf.mxu3 }
 0x3f1   : > { %v1023_v54 = vmax.f32 %v2413_v50, %v2415_v51 }
 0x3f3   : > { %1012 = vmax.xlane.f32.xlu1 %v1011_v52  ;;  %1024 = vmax.xlane.f32.xlu0 %v1023_v54 }
 0x3f5   : > { %v916_v60 = vpop.f32.mrf.mxu2 }
 0x3f8   : > { %v978_v55 = vpop.f32.mrf.mxu3 }
 0x3f9   : > { %v1026_v61 = vmax.f32 %v913_v57, %v978_v55 }
 0x3fb   : > { %1003 = vmax.xlane.f32.xlu1 %v1002_v56 }
 0x3fd   : > { %v2427_v63 = vpop.f32.mrf.mxu2 }
 0x400   : > { %v981_v59 = vpop.f32.mrf.mxu3 }
 0x401   : > { %v1029_v0 = vmax.f32 %v916_v60, %v981_v59 }
 0x403   : > { %1006 = vmax.xlane.f32.xlu1 %v1005_v58 }
 0x405   : > { %v2431_v2 = vpop.f32.mrf.mxu2 }
 0x408   : > { %v2425_v62 = vpop.f32.mrf.mxu3 }
 0x409   : > { %v1032_v3 = vmax.f32 %v2427_v63, %v2425_v62 }
 0x40b   : > { %1027 = vmax.xlane.f32.xlu1 %v1026_v61 }
 0x40d   : > { %v2439_v12 = vpop.f32.mrf.mxu2 }
 0x410   : > { %v2429_v1 = vpop.f32.mrf.mxu3 }
 0x411   : > { %v1035_v11 = vmax.f32 %v2431_v2, %v2429_v1 }
 0x413   : > { %1030 = vmax.xlane.f32.xlu1 %v1029_v0 }
 0x415   : > { %v2445_v15 = vpop.f32.mrf.mxu2 }
 0x418   : > { %v2435_v9 = vpop.f32.mrf.mxu3 }
 0x419   : > { %v1038_v13 = vmax.f32 %v2439_v12, %v2435_v9 }
 0x41b   : > { %1033 = vmax.xlane.f32.xlu1 %v1032_v3 }
 0x41d   : > { %v2451_v18 = vpop.f32.mrf.mxu2 }
 0x420   : > { %v2443_v14 = vpop.f32.mrf.mxu3 }
 0x421   : > { %v1041_v16 = vmax.f32 %v2445_v15, %v2443_v14 }
 0x423   : > { %1036 = vmax.xlane.f32.xlu1 %v1035_v11 }
 0x425   : > { %v2457_v22 = vpop.f32.mrf.mxu2 }
 0x428   : > { %v2449_v17 = vpop.f32.mrf.mxu3 }
 0x429   : > { %v1044_v19 = vmax.f32 %v2451_v18, %v2449_v17 }
 0x42b   : > { %1039 = vmax.xlane.f32.xlu1 %v1038_v13 }
 0x430   : > { %v2455_v20 = vpop.f32.mrf.mxu3 }
 0x431   : > { %v1047_v23 = vmax.f32 %v2457_v22, %v2455_v20 }
 0x433   : > { %1042 = vmax.xlane.f32.xlu1 %v1041_v16 }
 0x43b   : > { %1045 = vmax.xlane.f32.xlu1 %v1044_v19 }
 0x443   : > { %1048 = vmax.xlane.f32.xlu1 %v1047_v23 }
 0x44e   : > { %v2461_v24 = vpop.xlane.xlu1 %1015 }
 0x456   : > { %v2463_v26 = vpop.xlane.xlu1 %1018 }
 0x45e   : > { %v2465_v27 = vpop.xlane.xlu1 %1009 }
 0x466   : > { %v2467_v28 = vpop.xlane.xlu1 %1012 }
 0x46e   : > { %v2469_v29 = vpop.xlane.xlu1 %1003 }
 0x476   : > { %v1007_v30 = vpop.xlane.xlu1 %1006 }
 0x477   : > { %v1052_v48 = vsub.f32 %v2379_v38, %v1007_v30  ;;  %v1053_v49 = vsub.f32 %v2385_v41, %v1007_v30 }
 0x479   : > { %v1086_v33 = vmul.f32 1.442695, %v1052_v48  ;;  %v1088_v34 = vmul.f32 1.442695, %v1053_v49 }
 0x47b   : > { %1768 = vpow2.f32 %v1086_v33 }
 0x47c   : > { %1770 = vpow2.f32 %v1088_v34 }
 0x47e   : > { %v1028_v32 = vpop.xlane.xlu1 %1027 }
 0x47f   : > { %v1066_v25 = vsub.f32 %v913_v57, %v1028_v32  ;;  %v1067_v46 = vsub.f32 %v978_v55, %v1028_v32 }
 0x481   : > { %v2473_v47 = vpop.eup %1768  ;;  %v1114_v52 = vmul.f32 1.442695, %v1066_v25  ;;  %v1116_v54 = vmul.f32 1.442695, %v1067_v46 }
 0x482   : > { %v2475_v56 = vpop.eup %1770 }
 0x483   : > { %1772 = vpow2.f32 %v1114_v52  ;;  %v1149_v58 = vadd.f32 %v2475_v56, %v2473_v47 }
 0x484   : > { %1774 = vpow2.f32 %v1116_v54 }
 0x485   : > { %1150 = vadd.xlane.f32.xlu2 %v1149_v58 }
 0x486   : > { %v1031_v38 = vpop.xlane.xlu1 %1030 }
 0x487   : > { %v1068_v41 = vsub.f32 %v916_v60, %v1031_v38  ;;  %v1069_v61 = vsub.f32 %v981_v59, %v1031_v38 }
 0x489   : > { %v2479_v0 = vpop.eup %1772  ;;  %v1118_v3 = vmul.f32 1.442695, %v1068_v41  ;;  %v1120_v57 = vmul.f32 1.442695, %v1069_v61 }
 0x48a   : > { %v2481_v55 = vpop.eup %1774 }
 0x48b   : > { %1776 = vpow2.f32 %v1118_v3  ;;  %v1170_v11 = vadd.f32 %v2481_v55, %v2479_v0 }
 0x48c   : > { %1778 = vpow2.f32 %v1120_v57 }
 0x48d   : > { %1171 = vadd.xlane.f32.xlu1 %v1170_v11 }
 0x48e   : > { %v1034_v13 = vpop.xlane.xlu1 %1033 }
 0x48f   : > { %v1070_v16 = vsub.f32 %v2427_v63, %v1034_v13  ;;  %v1071_v19 = vsub.f32 %v2425_v62, %v1034_v13 }
 0x491   : > { %v2487_v23 = vpop.eup %1776  ;;  %v1122_v59 = vmul.f32 1.442695, %v1070_v16  ;;  %v1124_v60 = vmul.f32 1.442695, %v1071_v19 }
 0x492   : > { %v2489_v30 = vpop.eup %1778 }
 0x493   : > { %1780 = vpow2.f32 %v1122_v59  ;;  %v1173_v48 = vadd.f32 %v2489_v30, %v2487_v23 }
 0x494   : > { %1782 = vpow2.f32 %v1124_v60 }
 0x495   : > { %1174 = vadd.xlane.f32.xlu1 %v1173_v48 }
 0x496   : > { %v1037_v49 = vpop.xlane.xlu1 %1036 }
 0x497   : > { %v1072_v33 = vsub.f32 %v2431_v2, %v1037_v49  ;;  %v1073_v34 = vsub.f32 %v2429_v1, %v1037_v49 }
 0x499   : > { %v2495_v63 = vpop.eup %1780  ;;  %v1126_v62 = vmul.f32 1.442695, %v1072_v33  ;;  %v1128_v32 = vmul.f32 1.442695, %v1073_v34 }
 0x49a   : > { %v2497_v25 = vpop.eup %1782 }
 0x49b   : > { %1784 = vpow2.f32 %v1126_v62  ;;  %v1176_v46 = vadd.f32 %v2497_v25, %v2495_v63  ;;  %v1022_v62 = vpop.xlane.xlu2 %1021 }
 0x49c   : > { %1786 = vpow2.f32 %v1128_v32 }
 0x49d   : > { %1177 = vadd.xlane.f32.xlu1 %v1176_v46 }
 0x49e   : > { %v1040_v52 = vpop.xlane.xlu1 %1039 }
 0x49f   : > { %v1074_v54 = vsub.f32 %v2439_v12, %v1040_v52  ;;  %v1075_v58 = vsub.f32 %v2435_v9, %v1040_v52 }
 0x4a1   : > { %v2503_v2 = vpop.eup %1784  ;;  %v1130_v1 = vmul.f32 1.442695, %v1074_v54  ;;  %v1132_v38 = vmul.f32 1.442695, %v1075_v58 }
 0x4a2   : > { %v2505_v41 = vpop.eup %1786 }
 0x4a3   : > { %1788 = vpow2.f32 %v1130_v1  ;;  %v1179_v61 = vadd.f32 %v2505_v41, %v2503_v2 }
 0x4a4   : > { %1790 = vpow2.f32 %v1132_v38  ;;  %v1063_v38 = vsub.f32 %v2407_v45, %v1022_v62 }
 0x4a5   : > { %1180 = vadd.xlane.f32.xlu1 %v1179_v61 }
 0x4a6   : > { %v1043_v3 = vpop.xlane.xlu1 %1042 }
 0x4a7   : > { %v1076_v57 = vsub.f32 %v2445_v15, %v1043_v3  ;;  %v1077_v11 = vsub.f32 %v2443_v14, %v1043_v3 }
 0x4a9   : > { %v2511_v12 = vpop.eup %1788  ;;  %v1134_v9 = vmul.f32 1.442695, %v1076_v57  ;;  %v1136_v13 = vmul.f32 1.442695, %v1077_v11  ;;  %v1025_v57 = vpop.xlane.xlu0 %1024 }
 0x4aa   : > { %v2513_v16 = vpop.eup %1790 }
 0x4ab   : > { %1792 = vpow2.f32 %v1134_v9  ;;  %v1182_v19 = vadd.f32 %v2513_v16, %v2511_v12  ;;  %v1065_v9 = vsub.f32 %v2415_v51, %v1025_v57 }
 0x4ac   : > { %1794 = vpow2.f32 %v1136_v13 }
 0x4ad   : > { %1183 = vadd.xlane.f32.xlu1 %v1182_v19  ;;  %v1112_v19 = vmul.f32 1.442695, %v1065_v9  ;;  %v1050_v9 = vsub.f32 %v2376_v37, %v2469_v29 }
 0x4ae   : > { %v1046_v59 = vpop.xlane.xlu1 %1045 }
 0x4af   : > { %v1078_v60 = vsub.f32 %v2451_v18, %v1046_v59  ;;  %v1079_v48 = vsub.f32 %v2449_v17, %v1046_v59  ;;  %v1062_v17 = vsub.f32 %v2405_v36, %v1022_v62  ;;  %v1064_v36 = vsub.f32 %v2413_v50, %v1025_v57 }
 0x4b0   : > { %v1059_v50 = vsub.f32 %v2395_v31, %v2461_v24 }
 0x4b1   : > { %v2519_v15 = vpop.eup %1792  ;;  %v1138_v14 = vmul.f32 1.442695, %v1078_v60  ;;  %v1140_v49 = vmul.f32 1.442695, %v1079_v48  ;;  %v1106_v3 = vmul.f32 1.442695, %v1062_v17  ;;  %v1058_v48 = vsub.f32 %v2393_v44, %v2461_v24 }
 0x4b2   : > { %v2521_v33 = vpop.eup %1794  ;;  %v1110_v13 = vmul.f32 1.442695, %v1064_v36  ;;  %v1061_v44 = vsub.f32 %v2401_v21, %v2463_v26 }
 0x4b3   : > { %1796 = vpow2.f32 %v1138_v14  ;;  %v1185_v34 = vadd.f32 %v2521_v33, %v2519_v15  ;;  %v1098_v14 = vmul.f32 1.442695, %v1058_v48 }
 0x4b4   : > { %1798 = vpow2.f32 %v1140_v49  ;;  %v1100_v49 = vmul.f32 1.442695, %v1059_v50 }
 0x4b5   : > { %1186 = vadd.xlane.f32.xlu1 %v1185_v34 }
 0x4b6   : > { %v1049_v32 = vpop.xlane.xlu1 %1048 }
 0x4b7   : > { %v1080_v46 = vsub.f32 %v2457_v22, %v1049_v32  ;;  %v1081_v18 = vsub.f32 %v2455_v20, %v1049_v32  ;;  %v1108_v22 = vmul.f32 1.442695, %v1063_v38  ;;  %v1060_v32 = vsub.f32 %v2399_v35, %v2463_v26 }
 0x4b8   : > { %v1055_v35 = vsub.f32 %v2389_v53, %v2465_v27 }
 0x4b9   : > { %v2527_v52 = vpop.eup %1796  ;;  %v1142_v54 = vmul.f32 1.442695, %v1080_v46  ;;  %v1144_v58 = vmul.f32 1.442695, %v1081_v18  ;;  %v1102_v24 = vmul.f32 1.442695, %v1060_v32 }
 0x4ba   : > { %v2530_v1 = vpop.eup %1798  ;;  %v1104_v46 = vmul.f32 1.442695, %v1061_v44 }
 0x4bb   : > { %1800 = vpow2.f32 %v1142_v54  ;;  %v1188_v61 = vadd.f32 %v2530_v1, %v2527_v52  ;;  %v1054_v54 = vsub.f32 %v2383_v40, %v2465_v27  ;;  %v1057_v40 = vsub.f32 %v2391_v43, %v2467_v28 }
 0x4bc   : > { %1802 = vpow2.f32 %v1144_v58  ;;  %v1092_v58 = vmul.f32 1.442695, %v1055_v35 }
 0x4bd   : > { %1189 = vadd.xlane.f32.xlu1 %v1188_v61  ;;  %1804 = vpow2.f32 %v1106_v3  ;;  %v1090_v26 = vmul.f32 1.442695, %v1054_v54  ;;  %v1056_v3 = vsub.f32 %v2387_v42, %v2467_v28  ;;  %v1051_v42 = vsub.f32 %v2381_v39, %v2469_v29 }
 0x4be   : > { %1806 = vpow2.f32 %v1108_v22  ;;  %v1096_v22 = vmul.f32 1.442695, %v1057_v40  ;;  %v1082_v28 = vmul.f32 1.442695, %v1050_v9 }
 0x4bf   : > { %1808 = vpow2.f32 %v1110_v13  ;;  %v1094_v27 = vmul.f32 1.442695, %v1056_v3 }
 0x4c0   : > { %1810 = vpow2.f32 %v1112_v19 }
 0x4c1   : > { %v2535_v20 = vpop.eup %1800  ;;  %1812 = vpow2.f32 %v1098_v14 }
 0x4c2   : > { %v2538_v11 = vpop.eup %1802  ;;  %1814 = vpow2.f32 %v1100_v49 }
 0x4c3   : > { %v1191_v45 = vadd.f32 %v2538_v11, %v2535_v20  ;;  %v2543_v59 = vpop.eup %1804  ;;  %1816 = vpow2.f32 %v1102_v24 }
 0x4c4   : > { %v2545_v60 = vpop.eup %1806  ;;  %1818 = vpow2.f32 %v1104_v46 }
 0x4c5   : > { %1192 = vadd.xlane.f32.xlu1 %v1191_v45  ;;  %v1164_v51 = vadd.f32 %v2545_v60, %v2543_v59  ;;  %v2553_v34 = vpop.eup %1808  ;;  %1820 = vpow2.f32 %v1090_v26  ;;  %v1084_v45 = vmul.f32 1.442695, %v1051_v42 }
 0x4c6   : > { %v2555_v62 = vpop.eup %1810  ;;  %1822 = vpow2.f32 %v1092_v58 }
 0x4c7   : > { %v1167_v31 = vadd.f32 %v2555_v62, %v2553_v34  ;;  %v2563_v18 = vpop.eup %1812  ;;  %1824 = vpow2.f32 %v1094_v27 }
 0x4c8   : > { %v2565_v17 = vpop.eup %1814  ;;  %1826 = vpow2.f32 %v1096_v22 }
 0x4c9   : > { %v1158_v21 = vadd.f32 %v2565_v17, %v2563_v18  ;;  %v2573_v38 = vpop.eup %1816  ;;  %1828 = vpow2.f32 %v1082_v28 }
 0x4ca   : > { %v2575_v61 = vpop.eup %1818  ;;  %1830 = vpow2.f32 %v1084_v45 }
 0x4cb   : > { %v1161_v53 = vadd.f32 %v2575_v61, %v2573_v38  ;;  %v2583_v57 = vpop.eup %1820 }
 0x4cc   : > { %v2585_v36 = vpop.eup %1822 }
 0x4cd   : > { %1165 = vadd.xlane.f32.xlu1 %v1164_v51  ;;  %v1152_v43 = vadd.f32 %v2585_v36, %v2583_v57  ;;  %v2593_v13 = vpop.eup %1824 }
 0x4ce   : > { %v2595_v19 = vpop.eup %1826 }
 0x4cf   : > { %v1155_v37 = vadd.f32 %v2595_v19, %v2593_v13  ;;  %v2599_v48 = vpop.eup %1828 }
 0x4d0   : > { %v2601_v39 = vpop.eup %1830 }
 0x4d1   : > { %v1146_v50 = vadd.f32 %v2601_v39, %v2599_v48 }
 0x4d5   : > { %1168 = vadd.xlane.f32.xlu1 %v1167_v31 }
 0x4dd   : > { %1159 = vadd.xlane.f32.xlu1 %v1158_v21 }
 0x4e5   : > { %1162 = vadd.xlane.f32.xlu1 %v1161_v53 }
 0x4ed   : > { %1153 = vadd.xlane.f32.xlu1 %v1152_v43 }
 0x4f5   : > { %1156 = vadd.xlane.f32.xlu1 %v1155_v37 }
 0x4f8   : > { %v1151_v29 = vpop.xlane.xlu2 %1150 }
 0x4f9   : > { %1832 = vrcp.f32 %v1151_v29 }
 0x4fd   : > { %1147 = vadd.xlane.f32.xlu1 %v1146_v50 }
 0x4ff   : > { %v1833_v51 = vpop.eup %1832 }
 0x500   : > { %v1212_v14 = vmul.f32 %v1833_v51, %v2473_v47  ;;  %v1213_v49 = vmul.f32 %v1833_v51, %v2475_v56  ;;  %v1172_v32 = vpop.xlane.xlu1 %1171 }
 0x501   : > { %1834 = vrcp.f32 %v1172_v32 }
 0x502   : > { %v2611_v44 = vpack.c.bf16 %v1213_v49, %v1212_v14 }
 0x504   : > { %1259 = vst [vmem:[%s2613_s23 + $0x8] sm:$0xff] %v2611_v44 }
 0x507   : > { %v1835_v31 = vpop.eup %1834 }
 0x508   : > { %v1226_v24 = vmul.f32 %v1835_v31, %v2479_v0  ;;  %v1227_v46 = vmul.f32 %v1835_v31, %v2481_v55  ;;  %v1175_v54 = vpop.xlane.xlu1 %1174 }
 0x509   : > { %1836 = vrcp.f32 %v1175_v54 }
 0x50a   : > { %v1250_v47 = vpack.c.bf16 %v1227_v46, %v1226_v24 }
 0x50c   : > { %1266 = vst [vmem:[%s2613_s23 + $0x40] sm:$0xff] %v1250_v47  ;;  %v1308_v3 = vunpack.c.l.b16 %v1250_v47  ;;  %v1309_v53 = vunpack.c.h.b16 %v1250_v47 }
 0x50f   : > { %v1837_v56 = vpop.eup %1836 }
 0x510   : > { %v1228_v35 = vmul.f32 %v1837_v56, %v2487_v23  ;;  %v1229_v21 = vmul.f32 %v1837_v56, %v2489_v30  ;;  %v1178_v26 = vpop.xlane.xlu1 %1177 }
 0x511   : > { %1838 = vrcp.f32 %v1178_v26 }
 0x512   : > { %v1251_v58 = vpack.c.bf16 %v1229_v21, %v1228_v35 }
 0x514   : > { %v1310_v40 = vunpack.c.l.b16 %v1251_v58  ;;  %v1311_v0 = vunpack.c.h.b16 %v1251_v58  ;;  %1267 = vst [vmem:[%s2613_s23 + $0x48] sm:$0xff] %v1251_v58 }
 0x516   : > { %v2623_v55 = vpack.c.b16 %v1310_v40, %v1308_v3  ;;  %v2625_v27 = vpack.c.b16 %v1311_v0, %v1309_v53 }
 0x517   : > { %v1839_v22 = vpop.eup %1838 }
 0x518   : > { %v1230_v9 = vmul.f32 %v1839_v22, %v2495_v63  ;;  %v1231_v23 = vmul.f32 %v1839_v22, %v2497_v25  ;;  %v1181_v30 = vpop.xlane.xlu1 %1180 }
 0x519   : > { %1840 = vrcp.f32 %v1181_v30 }
 0x51a   : > { %v2629_v42 = vpack.c.bf16 %v1231_v23, %v1230_v9 }
 0x51c   : > { %1268 = vst [vmem:[%s2613_s23 + $0x50] sm:$0xff] %v2629_v42 }
 0x51f   : > { %v1841_v43 = vpop.eup %1840 }
 0x520   : > { %v1232_v28 = vmul.f32 %v1841_v43, %v2503_v2  ;;  %v1233_v45 = vmul.f32 %v1841_v43, %v2505_v41  ;;  %v1184_v37 = vpop.xlane.xlu1 %1183 }
 0x521   : > { %1842 = vrcp.f32 %v1184_v37 }
 0x522   : > { %v2635_v29 = vpack.c.bf16 %v1233_v45, %v1232_v28 }
 0x524   : > { %1269 = vst [vmem:[%s2613_s23 + $0x58] sm:$0xff] %v2635_v29 }
 0x527   : > { %v1843_v63 = vpop.eup %1842 }
 0x528   : > { %v1234_v25 = vmul.f32 %v1843_v63, %v2511_v12  ;;  %v1235_v50 = vmul.f32 %v1843_v63, %v2513_v16  ;;  %v1187_v51 = vpop.xlane.xlu1 %1186  ;;  %v1314_v63 = vunpack.c.l.b16 %v2635_v29 }
 0x529   : > { %1844 = vrcp.f32 %v1187_v51  ;;  %v1312_v51 = vunpack.c.l.b16 %v2629_v42 }
 0x52a   : > { %v1254_v14 = vpack.c.bf16 %v1235_v50, %v1234_v25  ;;  %v1315_v25 = vunpack.c.h.b16 %v2635_v29 }
 0x52c   : > { %1270 = vst [vmem:[%s2613_s23 + $0x60] sm:$0xff] %v1254_v14  ;;  %v1316_v23 = vunpack.c.l.b16 %v1254_v14  ;;  %v1317_v30 = vunpack.c.h.b16 %v1254_v14  ;;  %v1313_v14 = vunpack.c.h.b16 %v2629_v42 }
 0x52f   : > { %v1845_v2 = vpop.eup %1844 }
 0x530   : > { %v1236_v41 = vmul.f32 %v1845_v2, %v2519_v15  ;;  %v1237_v49 = vmul.f32 %v1845_v2, %v2521_v33  ;;  %v1190_v32 = vpop.xlane.xlu1 %1189  ;;  %v1334_v2 = vpack.c.b16 %v1314_v63, %v1312_v51  ;;  %v1385_v63 = vstv %s1384_s24 }
 0x531   : > { %1846 = vrcp.f32 %v1190_v32 }
 0x532   : > { %v1255_v31 = vpack.c.bf16 %v1237_v49, %v1236_v41  ;;  %v1335_v41 = vpack.c.b16 %v1315_v25, %v1313_v14  ;;  %v1388_v25 = vld [vmem:[%s321_s5] sm:$0xff] }
 0x534   : > { %1271 = vst [vmem:[%s2613_s23 + $0x68] sm:$0xff] %v1255_v31  ;;  %v1319_v22 = vunpack.c.h.b16 %v1255_v31 }
 0x536   : > { %v1337_v28 = vpack.c.b16 %v1319_v22, %v1317_v30 }
 0x537   : > { %v1847_v24 = vpop.eup %1846 }
 0x538   : > { %v1238_v46 = vmul.f32 %v1847_v24, %v2527_v52  ;;  %v1239_v12 = vmul.f32 %v1847_v24, %v2530_v1  ;;  %v1193_v16 = vpop.xlane.xlu1 %1192 }
 0x539   : > { %1848 = vrcp.f32 %v1193_v16 }
 0x53a   : > { %v1256_v54 = vpack.c.bf16 %v1239_v12, %v1238_v46 }
 0x53c   : > { %1272 = vst [vmem:[%s2613_s23 + $0x70] sm:$0xff] %v1256_v54  ;;  %v1320_v21 = vunpack.c.l.b16 %v1256_v54  ;;  %v1321_v58 = vunpack.c.h.b16 %v1256_v54 }
 0x53f   : > { %v1849_v47 = vpop.eup %1848 }
 0x540   : > { %v1240_v56 = vmul.f32 %v1849_v47, %v2535_v20  ;;  %v1241_v15 = vmul.f32 %v1849_v47, %v2538_v11  ;;  %v1166_v33 = vpop.xlane.xlu1 %1165  ;;  %v1318_v11 = vunpack.c.l.b16 %v1255_v31 }
 0x541   : > { %1850 = vrcp.f32 %v1166_v33 }
 0x542   : > { %v1257_v35 = vpack.c.bf16 %v1241_v15, %v1240_v56  ;;  %v1336_v43 = vpack.c.b16 %v1318_v11, %v1316_v23 }
 0x544   : > { %v1322_v26 = vunpack.c.l.b16 %v1257_v35  ;;  %v1323_v3 = vunpack.c.h.b16 %v1257_v35  ;;  %1273 = vst [vmem:[%s2613_s23 + $0x78] sm:$0xff] %v1257_v35 }
 0x546   : > { %v1338_v52 = vpack.c.b16 %v1322_v26, %v1320_v21  ;;  %v1339_v1 = vpack.c.b16 %v1323_v3, %v1321_v58 }
 0x547   : > { %v1851_v40 = vpop.eup %1850 }
 0x548   : > { %v1222_v53 = vmul.f32 %v1851_v40, %v2543_v59  ;;  %v1223_v0 = vmul.f32 %v1851_v40, %v2545_v60  ;;  %1356 = vmatpush.bf16.xpose.msrb.mxu0 %v1338_v52  ;;  %1370 = vmatpush.bf16.xpose.msrb.mxu1 %v1339_v1  ;;  %v1169_v20 = vpop.xlane.xlu1 %1168 }
 0x549   : > { %1852 = vrcp.f32 %v1169_v20 }
 0x54a   : > { %v1248_v9 = vpack.c.bf16 %v1223_v0, %v1222_v53 }
 0x54c   : > { %1264 = vst [vmem:[%s2613_s23 + $0x30] sm:$0xff] %v1248_v9  ;;  %v1304_v16 = vunpack.c.l.b16 %v1248_v9  ;;  %v1305_v54 = vunpack.c.h.b16 %v1248_v9 }
 0x54f   : > { %v1853_v45 = vpop.eup %1852 }
 0x550   : > { %v1224_v37 = vmul.f32 %v1853_v45, %v2553_v34  ;;  %v1225_v59 = vmul.f32 %v1853_v45, %v2555_v62  ;;  %1357 = vmatpush.bf16.xpose.msrb.mxu0 %v1336_v43  ;;  %1371 = vmatpush.bf16.xpose.msrb.mxu1 %v1337_v28  ;;  %v1160_v60 = vpop.xlane.xlu1 %1159  ;;  %v1294_v28 = vunpack.c.l.b16 %v2611_v44 }
 0x551   : > { %1854 = vrcp.f32 %v1160_v60 }
 0x552   : > { %v1249_v50 = vpack.c.bf16 %v1225_v59, %v1224_v37  ;;  %v1295_v37 = vunpack.c.h.b16 %v2611_v44 }
 0x554   : > { %1265 = vst [vmem:[%s2613_s23 + $0x38] sm:$0xff] %v1249_v50 }
 0x557   : > { %v1855_v34 = vpop.eup %1854 }
 0x558   : > { %v1218_v62 = vmul.f32 %v1855_v34, %v2563_v18  ;;  %v1219_v49 = vmul.f32 %v1855_v34, %v2565_v17  ;;  %1358 = vmatpush.bf16.xpose.msrb.mxu0 %v1334_v2  ;;  %1372 = vmatpush.bf16.xpose.msrb.mxu1 %v1335_v41  ;;  %v1163_v32 = vpop.xlane.xlu1 %1162  ;;  %v1306_v18 = vunpack.c.l.b16 %v1249_v50  ;;  %v1307_v17 = vunpack.c.h.b16 %v1249_v50 }
 0x559   : > { %1856 = vrcp.f32 %v1163_v32 }
 0x55a   : > { %v1246_v31 = vpack.c.bf16 %v1219_v49, %v1218_v62  ;;  %v1330_v47 = vpack.c.b16 %v1306_v18, %v1304_v16  ;;  %v1331_v56 = vpack.c.b16 %v1307_v17, %v1305_v54 }
 0x55c   : > { %1262 = vst [vmem:[%s2613_s23 + $0x20] sm:$0xff] %v1246_v31  ;;  %v1300_v21 = vunpack.c.l.b16 %v1246_v31  ;;  %v1301_v26 = vunpack.c.h.b16 %v1246_v31 }
 0x55f   : > { %v1857_v29 = vpop.eup %1856 }
 0x560   : > { %v1220_v24 = vmul.f32 %v1857_v29, %v2573_v38  ;;  %v1221_v42 = vmul.f32 %v1857_v29, %v2575_v61  ;;  %1359 = vmatpush.bf16.xpose.msrb.mxu0 %v2623_v55  ;;  %1373 = vmatpush.bf16.xpose.msrb.mxu1 %v2625_v27  ;;  %v1154_v46 = vpop.xlane.xlu1 %1153 }
 0x561   : > { %1858 = vrcp.f32 %v1154_v46 }
 0x562   : > { %v1247_v12 = vpack.c.bf16 %v1221_v42, %v1220_v24 }
 0x564   : > { %1263 = vst [vmem:[%s2613_s23 + $0x28] sm:$0xff] %v1247_v12  ;;  %v1302_v27 = vunpack.c.l.b16 %v1247_v12  ;;  %v1303_v33 = vunpack.c.h.b16 %v1247_v12 }
 0x566   : > { %v1328_v58 = vpack.c.b16 %v1302_v27, %v1300_v21  ;;  %v1329_v3 = vpack.c.b16 %v1303_v33, %v1301_v26 }
 0x567   : > { %v1859_v15 = vpop.eup %1858 }
 0x568   : > { %v1214_v38 = vmul.f32 %v1859_v15, %v2583_v57  ;;  %v1215_v61 = vmul.f32 %v1859_v15, %v2585_v36  ;;  %1360 = vmatpush.bf16.xpose.msrb.mxu0 %v1330_v47  ;;  %1374 = vmatpush.bf16.xpose.msrb.mxu1 %v1331_v56  ;;  %v1157_v55 = vpop.xlane.xlu1 %1156 }
 0x569   : > { %1860 = vrcp.f32 %v1157_v55 }
 0x56a   : > { %v1244_v35 = vpack.c.bf16 %v1215_v61, %v1214_v38 }
 0x56c   : > { %1260 = vst [vmem:[%s2613_s23 + $0x10] sm:$0xff] %v1244_v35  ;;  %v1296_v53 = vunpack.c.l.b16 %v1244_v35  ;;  %v1297_v20 = vunpack.c.h.b16 %v1244_v35 }
 0x56f   : > { %v1861_v52 = vpop.eup %1860 }
 0x570   : > { %v1216_v1 = vmul.f32 %v1861_v52, %v2593_v13  ;;  %v1217_v57 = vmul.f32 %v1861_v52, %v2595_v19  ;;  %1361 = vmatpush.bf16.xpose.msrb.mxu0 %v1328_v58  ;;  %1375 = vmatpush.bf16.xpose.msrb.mxu1 %v1329_v3  ;;  %v1148_v36 = vpop.xlane.xlu1 %1147 }
 0x571   : > { %1862 = vrcp.f32 %v1148_v36 }
 0x572   : > { %v1245_v40 = vpack.c.bf16 %v1217_v57, %v1216_v1 }
 0x574   : > { %v1298_v0 = vunpack.c.l.b16 %v1245_v40  ;;  %v1299_v11 = vunpack.c.h.b16 %v1245_v40  ;;  %1261 = vst [vmem:[%s2613_s23 + $0x18] sm:$0xff] %v1245_v40 }
 0x576   : > { %v1326_v22 = vpack.c.b16 %v1298_v0, %v1296_v53  ;;  %v1327_v9 = vpack.c.b16 %v1299_v11, %v1297_v20 }
 0x577   : > { %v1863_v23 = vpop.eup %1862 }
 0x578   : > { %v1210_v30 = vmul.f32 %v1863_v23, %v2599_v48  ;;  %v1211_v13 = vmul.f32 %v1863_v23, %v2601_v39  ;;  %1362 = vmatpush.bf16.xpose.msrb.mxu0 %v1326_v22  ;;  %1376 = vmatpush.bf16.xpose.msrb.mxu1 %v1327_v9 }
 0x57a   : > { %v1242_v19 = vpack.c.bf16 %v1211_v13, %v1210_v30 }
 0x57c   : > { %v1292_v43 = vunpack.c.l.b16 %v1242_v19  ;;  %v1293_v45 = vunpack.c.h.b16 %v1242_v19  ;;  %1258 = vst [vmem:[%s2613_s23] sm:$0xff] %v1242_v19 }
 0x57e   : > { %v1324_v59 = vpack.c.b16 %v1294_v28, %v1292_v43  ;;  %v1325_v60 = vpack.c.b16 %v1295_v37, %v1293_v45 }
 0x580   : > { %1363 = vmatpush.bf16.xpose.msrb.mxu0 %v1324_v59  ;;  %1377 = vmatpush.bf16.xpose.msrb.mxu1 %v1325_v60 }
 0x587   : > { %1364 = vmatmul.bf16.vlgmr.msrb.gmra.mxu0 %v1274_v7  ;;  %1378 = vmatmul.bf16.vlgmr.msrb.gmra.mxu1 %v1275_v10  ;;  %v1389_v7 = vld [vmem:[%s321_s5 + $0x8] sm:$0xff] }
 0x604   : > { %v1365_v48 = vpop.f32.mrf.mxu0  ;;  %v1379_v39 = vpop.f32.mrf.mxu1 }
 0x605   : > { %v1380_v44 = vadd.f32 %v1379_v39, %v1365_v48 }
 0x607   : > { %v1386_v50 = vmul.f32 %v1385_v63, %v1380_v44 }
 0x609   : > { %v1390_v51 = vadd.f32 %v1388_v25, %v1386_v50 }
 0x60b   : > { %1392 = vst [vmem:[%s351_s11] sm:$0xff] %v1390_v51 }
 0x60c   : > { %v1367_v14 = vpop.f32.mrf.mxu0  ;;  %v1381_v4 = vpop.f32.mrf.mxu1 }
 0x60d   : > { %v1382_v6 = vadd.f32 %v1381_v4, %v1367_v14 }
 0x60f   : > { %v1387_v2 = vmul.f32 %v1385_v63, %v1382_v6  ;;  %1405 = sbr.rel (!%p2070_p8) target bundleno = 1564 (0x61c), region = 86 }
 0x611   : > { %v1391_v5 = vadd.f32 %v1389_v7, %v1387_v2 }
 0x612   : > { %v1440_v8 = vld [vmem:[%s351_s11] sm:$0xff] (%p2070_p8) }
 0x613   : > { %1393 = vst [vmem:[%s351_s11 + $0x8] sm:$0xff] %v1391_v5 }
 0x614   : > { %1441 = vst [vmem:[%s1409_s25] sm:$0xff] %v1440_v8 }
 0x61a   : > { %v1442_v10 = vld [vmem:[%s351_s11 + $0x8] sm:$0xff] }
 0x61b   : > { %1443 = vst [vmem:[%s1409_s25 + $0x10] sm:$0xff] %v1442_v10 }
 0x61c PF: > { %s1683_s5 = sshll.u32 %s1942_s29, 5  ;;  %s1678_s14 = sshll.u32 %s1946_s30, 6 }
 0x61d   : > { %s1455_s0 = sadd.s32 %s1683_s5, %s1678_s14  ;;  %s1458_s1 = sshll.u32 %s2613_s23, 4  ;;  %s1459_s1 = int_to_ptr.vmem [resolvable:$true] %s1458_s1 }
 0x61e   : > { %s1679_s2 = sshll.u32 %s1455_s0, 2  ;;  %s1884_s30 = scalar_lea.hbm %s2748_s7, 512 }
 0x61f   : > { %s1457_s11 = scalar_lea.hbm %s2748_s7, %s1679_s2 }
 0x620   : > { %s1460_s3 = sshll.u32 %s1457_s11, 4  ;;  %s1461_s3 = int_to_ptr.hbm [resolvable:$true] %s1460_s3 }
 0x621   : > { %s1878_s15 = sshra.s32 %s1461_s3, 4  ;;  %s1879_s15 = int_to_ptr.hbm [resolvable:$true] %s1878_s15 }
 0x622   : > { %s1880_s22 = scalar_lea.hbm %s1879_s15, 128  ;;  %p1885_p5 = scmp.lt.s32.totalorder %s1879_s15, %s2748_s7 }
 0x623   : > { %p1881_p2 = scmp.ne.s32.totalorder %s1879_s15, %s1880_s22  ;;  %p1886_p6 = scmp.lt.s32.totalorder %s1884_s30, %s1880_s22 }
 0x625   : > { %p1882_p3 = pnand %p1881_p2, %p2070_p8  ;;  %p1887_p7 = por %p1886_p6, %p1885_p5 }
 0x627   : > { %p1883_p4 = pneg %p1882_p3 }
 0x629   : > { %p1888_p10 = pnand %p1887_p7, %p1883_p4 }
 0x62b   : > { %1891 = shalt.err (!%p1888_p10)
}
 0x62c   : > { %s1965_s2 = smov 128   ;;  %s1966_s14 = smov 8  }
 0x62d   : > { %s2760_s25 = scalar_lea.sflag [#allocation7], %s2606_s20 }
 0x62e   : > { %1684 = dma.vmem_to_hbm [thread:$0]  (%p2070_p8), %s1459_s1, 2048, %s1461_s3, %s2760_s25, %s1965_s2, %s1965_s2, %s1966_s14  }
 0x62f PF: > { %p1690_p11 = scmp.ge.s32.totalorder %s1958_s10, 2  ;;  %s1482_s5 = sand.u32 1, %s1930_s26  }
 0x630   : > { %s1483_s18 = scalar_lea.sflag [#allocation7], %s1482_s5 }
 0x631   : > { %p1687_p12 = pnand %p1690_p11, %p2074_p9 }
 0x633   : > { %p1688_p13 = pneg %p1687_p12 }
 0x635   : > { %1925 = dma.done.wait (%p1688_p13), %s1483_s18, 2048  }
 0x636   : > { %1927 = vsyncadd (%p1688_p13), %s1483_s18, 4294965248  ;;  %s22_s10 = sadd.s32 1, %s1958_s10   ;;  %s2761_s26 = smov %s1934_s27 }
 0x637   : > { %p19_p0 = scmp.ge.s32.totalorder %s22_s10, 6   ;;  %s2762_s27 = smov %s1938_s28 }
 0x638   : > { %s2763_s28 = smov %s2082_s21  ;;  %s2764_s29 = smov %s1950_s8 }
 0x639   : > { %s2765_s30 = smov %s1954_s9  ;;  %s2766_s8 = smov %s2769_s12 }
 0x63a   : > { %s2767_s9 = smov %s2773_s13  ;;  %21 = sbr.rel (!%p19_p0) target bundleno = 11 (0xb), region = 179 }
 0x63f   :  { %1489 = vsyncpa [#allocation7], 1 }
 0x640   :  { %1491 = vsyncpa [#allocation7 + $0x1], 1 }

</bundles_post_ra>
